<compile_context>
chip_gen: v7x
topology: tpu7x:2x2x1
jax: 0.10.0
libtpu: 0.0.40
codegen_flags: <defaults>
</compile_context>

<pallas_src>
import functools

import jax
import jax.numpy as jnp
import numpy as np
from jax.experimental import pallas as pl
from jax.experimental.pallas import tpu as pltpu

LANE = 128


def _round_up(x, m):
    return ((x + m - 1) // m) * m


def _vae_kernel(x_ref, eps_ref,
                # fused, lane-padded encoder:  [D,2E1], [1,2E1], [2E1,2E2], [1,2E2], [2E2,2E3], [1,2E3]
                we1, be1, we2, be2, we3, be3,
                # fused, lane-padded decoder:  [E3,2D1h+D3], [1,2D1h+D3], [2D1h,2D2], [1,2D2], [2D2,2D3], [1,2D3]
                wd1, bd1, wd2, bd2, wd3, bd3,
                out_ref, *, E3, D1h, D3):
    f32 = jnp.float32
    act = jnp.tanh

    x = x_ref[...]
    eps = eps_ref[...]                       # [tm, E3], zero beyond the first d lanes

    # ---- fused encoder (mu and log_var branches packed along 128-aligned segments) ----
    h1 = act(jnp.dot(x, we1[...], preferred_element_type=f32) + be1[...])      # [tm, 2*E1]
    h2 = act(jnp.dot(h1, we2[...], preferred_element_type=f32) + be2[...])     # [tm, 2*E2]
    e3 = jnp.dot(h2, we3[...], preferred_element_type=f32) + be3[...]          # [tm, 2*E3]
    mu_z = e3[:, :E3]                        # vreg-aligned slice
    lv_z = e3[:, E3:]                        # vreg-aligned slice

    # ---- reparametrization trick (padding lanes stay exactly 0) ----
    z = mu_z + jnp.exp(0.5 * lv_z) * eps                                        # [tm, E3]

    # ---- fused decoder (mu, log_var and frozen residual packed together) ----
    g1 = jnp.dot(z, wd1[...], preferred_element_type=f32) + bd1[...]            # [tm, 2*D1h + D3]
    h1d = act(g1[:, :2 * D1h])               # vreg-aligned slice
    res = g1[:, 2 * D1h:]                    # z @ A^T + b (frozen resnet), [tm, D3]
    h2d = act(jnp.dot(h1d, wd2[...], preferred_element_type=f32) + bd2[...])    # [tm, 2*D2]
    d3 = jnp.dot(h2d, wd3[...], preferred_element_type=f32) + bd3[...]          # [tm, 2*D3]
    mu_x = d3[:, :D3] + res
    lv_x = d3[:, D3:]

    # ---- single full-width, unmasked store of the lane-aligned slab ----
    out_ref[...] = jnp.concatenate([mu_x, lv_x, z, mu_z, lv_z], axis=-1)


def vae_gels_forward(x, eps, packed, *, tm=None):
    """x: [N, D] f32, eps: [N, d] f32, packed: dict from pack_params().
    Returns (mu_x, log_var_x, z_rep, mu_z, log_var_z)."""
    N, D = x.shape
    d = eps.shape[1]
    E3 = _round_up(d, LANE)                  # z / mu_z / log_var_z segment width
    D3 = _round_up(D, LANE)                  # mu_x / log_var_x segment width
    D1h = (packed["wd1"].shape[1] - D3) // 2  # decoder layer-1 per-branch segment width

    # Batch tile: as large as reasonable to amortize the ~600-cycle per-step cost
    # on single-TC chips; sweepable via tm=.
    if tm is None:
        tm = min(_round_up(N, 8), 1024)
    tm = max(8, _round_up(tm, 8))

    # Lane-pad eps so z occupies a full 128-lane segment (padding lanes stay 0).
    if E3 != d:
        eps = jnp.pad(eps, ((0, 0), (0, E3 - d)))

    # Batch pad only when tm does not divide N (no-op for the test shapes).
    Np = _round_up(max(N, tm), tm)
    if Np != N:
        x = jnp.pad(x, ((0, Np - N), (0, 0)))
        eps = jnp.pad(eps, ((0, Np - N), (0, 0)))

    slab_w = 2 * D3 + 3 * E3                 # multiple of 128 by construction

    weight_order = ["we1", "be1", "we2", "be2", "we3", "be3",
                    "wd1", "bd1", "wd2", "bd2", "wd3", "bd3"]
    weights = [packed[k] for k in weight_order]

    def batch_spec(cols):
        return pl.BlockSpec((tm, cols), lambda i: (i, 0))

    def resident_spec(shape):
        # Constant index_map -> weight DMA'd once and kept resident across grid steps.
        return pl.BlockSpec(shape, lambda i: (0, 0))

    grid_spec = pl.GridSpec(
        grid=(Np // tm,),
        in_specs=[batch_spec(D), batch_spec(E3)] + [resident_spec(w.shape) for w in weights],
        out_specs=batch_spec(slab_w),
    )

    # Advisory cost hint for the XLA scheduler.
    mats = weights[0::2]
    flops = 2 * Np * sum(int(w.shape[0]) * int(w.shape[1]) for w in mats)
    transcendentals = Np * (int(weights[0].shape[1]) + int(weights[2].shape[1])
                            + 2 * D1h + int(weights[8].shape[1]) + E3)
    bytes_accessed = 4 * (Np * (D + E3 + slab_w)
                          + sum(int(np.prod(w.shape)) for w in weights))
    cost = pl.CostEstimate(flops=flops, transcendentals=transcendentals,
                           bytes_accessed=bytes_accessed)

    kernel = functools.partial(_vae_kernel, E3=E3, D1h=D1h, D3=D3)

    slab = pl.pallas_call(
        kernel,
        out_shape=jax.ShapeDtypeStruct((Np, slab_w), jnp.float32),
        grid_spec=grid_spec,
        compiler_params=pltpu.CompilerParams(dimension_semantics=("parallel",)),
        cost_estimate=cost,
    )(x, eps, *weights)

    slab = slab[:N]
    mu_x = slab[:, 0:D]
    lv_x = slab[:, D3:D3 + D]
    z = slab[:, 2 * D3:2 * D3 + d]
    mu_z = slab[:, 2 * D3 + E3:2 * D3 + E3 + d]
    lv_z = slab[:, 2 * D3 + 2 * E3:2 * D3 + 2 * E3 + d]
    return mu_x, lv_x, z, mu_z, lv_z


def make_params(D, d, H, key):
    """Deterministic synthetic parameters. Weights are [in, out]; biases are [1, out]."""
    ks = iter(jax.random.split(key, 32))

    def lin(fan_in, fan_out):
        bound = 1.0 / np.sqrt(fan_in)
        w = jax.random.uniform(next(ks), (fan_in, fan_out), jnp.float32, -bound, bound)
        b = jax.random.uniform(next(ks), (1, fan_out), jnp.float32, -bound, bound)
        return w, b

    p = {}
    # encoder mu: D -> 2H -> H -> d
    p["we1"], p["be1"] = lin(D, 2 * H)
    p["we2"], p["be2"] = lin(2 * H, H)
    p["we3"], p["be3"] = lin(H, d)
    # encoder log_var
    p["wl1"], p["bl1"] = lin(D, 2 * H)
    p["wl2"], p["bl2"] = lin(2 * H, H)
    p["wl3"], p["bl3"] = lin(H, d)
    # decoder mu: d -> H -> 2H -> D
    p["wd1"], p["bd1"] = lin(d, H)
    p["wd2"], p["bd2"] = lin(H, 2 * H)
    p["wd3"], p["bd3"] = lin(2 * H, D)
    # decoder log_var
    p["wv1"], p["bv1"] = lin(d, H)
    p["wv2"], p["bv2"] = lin(H, 2 * H)
    p["wv3"], p["bv3"] = lin(2 * H, D)
    # frozen residual linear: PyTorch weight = eye(D, d) => transposed eye(d, D) here
    p["wr"] = jnp.eye(d, D, dtype=jnp.float32)
    p["br"] = jnp.zeros((1, D), dtype=jnp.float32)
    return p


def pack_params(p):
    """Fuse the mu / log_var branches into wide weights whose logical sub-blocks
    are padded to 128-lane boundaries (slices in the kernel become vreg-aligned)."""
    D = p["we1"].shape[0]
    H = p["we2"].shape[1]
    d = p["we3"].shape[1]

    E1 = _round_up(2 * H, LANE)
    E2 = _round_up(H, LANE)
    E3 = _round_up(d, LANE)
    D1h = _round_up(H, LANE)
    D2 = _round_up(2 * H, LANE)
    D3 = _round_up(D, LANE)

    def embed(shape, *placements):
        out = jnp.zeros(shape, jnp.float32)
        for r, c, blk in placements:
            out = out.at[r:r + blk.shape[0], c:c + blk.shape[1]].set(blk)
        return out

    q = {}
    # encoder layer 1: D -> [mu 2H | pad | lv 2H | pad]
    q["we1"] = embed((D, 2 * E1), (0, 0, p["we1"]), (0, E1, p["wl1"]))
    q["be1"] = embed((1, 2 * E1), (0, 0, p["be1"]), (0, E1, p["bl1"]))
    # encoder layer 2: block-diagonal on 128-aligned segments
    q["we2"] = embed((2 * E1, 2 * E2), (0, 0, p["we2"]), (E1, E2, p["wl2"]))
    q["be2"] = embed((1, 2 * E2), (0, 0, p["be2"]), (0, E2, p["bl2"]))
    # encoder layer 3
    q["we3"] = embed((2 * E2, 2 * E3), (0, 0, p["we3"]), (E2, E3, p["wl3"]))
    q["be3"] = embed((1, 2 * E3), (0, 0, p["be3"]), (0, E3, p["bl3"]))
    # decoder layer 1 (+ frozen residual folded in): [mu H | pad | lv H | pad | res D | pad]
    q["wd1"] = embed((E3, 2 * D1h + D3),
                     (0, 0, p["wd1"]), (0, D1h, p["wv1"]), (0, 2 * D1h, p["wr"]))
    q["bd1"] = embed((1, 2 * D1h + D3),
                     (0, 0, p["bd1"]), (0, D1h, p["bv1"]), (0, 2 * D1h, p["br"]))
    # decoder layer 2
    q["wd2"] = embed((2 * D1h, 2 * D2), (0, 0, p["wd2"]), (D1h, D2, p["wv2"]))
    q["bd2"] = embed((1, 2 * D2), (0, 0, p["bd2"]), (0, D2, p["bv2"]))
    # decoder layer 3
    q["wd3"] = embed((2 * D2, 2 * D3), (0, 0, p["wd3"]), (D2, D3, p["wv3"]))
    q["bd3"] = embed((1, 2 * D3), (0, 0, p["bd3"]), (0, D3, p["bv3"]))
    return q


def reference_forward(x, eps, p):
    act = jnp.tanh

    def mlp3(inp, w1, b1, w2, b2, w3, b3):
        h = act(inp @ w1 + b1)
        h = act(h @ w2 + b2)
        return h @ w3 + b3

    mu_z = mlp3(x, p["we1"], p["be1"], p["we2"], p["be2"], p["we3"], p["be3"])
    lv_z = mlp3(x, p["wl1"], p["bl1"], p["wl2"], p["bl2"], p["wl3"], p["bl3"])
    z = mu_z + jnp.exp(0.5 * lv_z) * eps
    mu_x = mlp3(z, p["wd1"], p["bd1"], p["wd2"], p["bd2"], p["wd3"], p["bd3"]) + z @ p["wr"] + p["br"]
    lv_x = mlp3(z, p["wv1"], p["bv1"], p["wv2"], p["bv2"], p["wv3"], p["bv3"])
    return mu_x, lv_x, z, mu_z, lv_z


if __name__ == "__main__":
    # small shapes implied by the forward: x is [batch, D]
    N, D, d, H = 16, 32, 8, 16

    key = jax.random.PRNGKey(0)
    k_x, k_eps, k_p = jax.random.split(key, 3)

    x = jax.random.normal(k_x, (N, D), dtype=jnp.float32)
    eps = jax.random.normal(k_eps, (N, d), dtype=jnp.float32)  # randn_like(mu_z)
    raw_params = make_params(D, d, H, k_p)
    packed_params = pack_params(raw_params)

    outs = vae_gels_forward(x, eps, packed_params)
    outs = jax.block_until_ready(outs)

    refs = reference_forward(x, eps, raw_params)
    for o, r in zip(outs, refs):
        np.testing.assert_allclose(np.asarray(o), np.asarray(r), rtol=1e-5, atol=1e-5)

    print("KERNEL_OK")
</pallas_src>

<mosaic_0001>
module attributes {stable_mosaic.version = 11 : i64} {
  func.func @_vae_kernel(%arg0: i32, %arg1: memref<16x32xf32, #tpu.memory_space<vmem>>, %arg2: memref<16x128xf32, #tpu.memory_space<vmem>>, %arg3: memref<32x256xf32, #tpu.memory_space<vmem>>, %arg4: memref<1x256xf32, #tpu.memory_space<vmem>>, %arg5: memref<256x256xf32, #tpu.memory_space<vmem>>, %arg6: memref<1x256xf32, #tpu.memory_space<vmem>>, %arg7: memref<256x256xf32, #tpu.memory_space<vmem>>, %arg8: memref<1x256xf32, #tpu.memory_space<vmem>>, %arg9: memref<128x384xf32, #tpu.memory_space<vmem>>, %arg10: memref<1x384xf32, #tpu.memory_space<vmem>>, %arg11: memref<256x256xf32, #tpu.memory_space<vmem>>, %arg12: memref<1x256xf32, #tpu.memory_space<vmem>>, %arg13: memref<256x256xf32, #tpu.memory_space<vmem>>, %arg14: memref<1x256xf32, #tpu.memory_space<vmem>>, %arg15: memref<16x640xf32, #tpu.memory_space<vmem>>) attributes {dimension_semantics = [#tpu.dimension_semantics<parallel>], iteration_bounds = array<i64: 1>, scalar_prefetch = 0 : i64, scratch_operands = 0 : i64, tpu.core_type = #tpu.core_type<tc>, window_params = [{transform_indices = @transform_0, window_bounds = array<i64: 16, 32>}, {transform_indices = @transform_1, window_bounds = array<i64: 16, 128>}, {pipeline_mode = #tpu.pipeline_mode<synchronous>, transform_indices = @transform_2, window_bounds = array<i64: 32, 256>}, {pipeline_mode = #tpu.pipeline_mode<synchronous>, transform_indices = @transform_3, window_bounds = array<i64: 1, 256>}, {pipeline_mode = #tpu.pipeline_mode<synchronous>, transform_indices = @transform_4, window_bounds = array<i64: 256, 256>}, {pipeline_mode = #tpu.pipeline_mode<synchronous>, transform_indices = @transform_5, window_bounds = array<i64: 1, 256>}, {pipeline_mode = #tpu.pipeline_mode<synchronous>, transform_indices = @transform_6, window_bounds = array<i64: 256, 256>}, {pipeline_mode = #tpu.pipeline_mode<synchronous>, transform_indices = @transform_7, window_bounds = array<i64: 1, 256>}, {pipeline_mode = #tpu.pipeline_mode<synchronous>, transform_indices = @transform_8, window_bounds = array<i64: 128, 384>}, {pipeline_mode = #tpu.pipeline_mode<synchronous>, transform_indices = @transform_9, window_bounds = array<i64: 1, 384>}, {pipeline_mode = #tpu.pipeline_mode<synchronous>, transform_indices = @transform_10, window_bounds = array<i64: 256, 256>}, {pipeline_mode = #tpu.pipeline_mode<synchronous>, transform_indices = @transform_11, window_bounds = array<i64: 1, 256>}, {pipeline_mode = #tpu.pipeline_mode<synchronous>, transform_indices = @transform_12, window_bounds = array<i64: 256, 256>}, {pipeline_mode = #tpu.pipeline_mode<synchronous>, transform_indices = @transform_13, window_bounds = array<i64: 1, 256>}, {transform_indices = @transform_14, window_bounds = array<i64: 16, 640>}]} {
    %c0 = arith.constant 0 : index
    %c0_0 = arith.constant 0 : index
    %0 = vector.load %arg1[%c0, %c0_0] : memref<16x32xf32, #tpu.memory_space<vmem>>, vector<16x32xf32>
    %c0_1 = arith.constant 0 : index
    %c0_2 = arith.constant 0 : index
    %1 = vector.load %arg2[%c0_1, %c0_2] : memref<16x128xf32, #tpu.memory_space<vmem>>, vector<16x128xf32>
    %c0_3 = arith.constant 0 : index
    %c0_4 = arith.constant 0 : index
    %2 = vector.load %arg3[%c0_3, %c0_4] : memref<32x256xf32, #tpu.memory_space<vmem>>, vector<32x256xf32>
    %cst = arith.constant dense<0.000000e+00> : vector<16x256xf32>
    %3 = tpu.matmul %0, %2, %cst {dimension_numbers = #tpu.dot_dimension_numbers<[1], [0], [0], [1], [0, 0, 1, 1], [], []>} : vector<16x32xf32>, vector<32x256xf32>, vector<16x256xf32> -> vector<16x256xf32>
    %c0_5 = arith.constant 0 : index
    %c0_6 = arith.constant 0 : index
    %4 = vector.load %arg4[%c0_5, %c0_6] : memref<1x256xf32, #tpu.memory_space<vmem>>, vector<1x256xf32>
    %5 = vector.broadcast %4 : vector<1x256xf32> to vector<16x256xf32>
    %6 = arith.addf %3, %5 : vector<16x256xf32>
    %7 = math.tanh %6 : vector<16x256xf32>
    %c0_7 = arith.constant 0 : index
    %c0_8 = arith.constant 0 : index
    %8 = vector.load %arg5[%c0_7, %c0_8] : memref<256x256xf32, #tpu.memory_space<vmem>>, vector<256x256xf32>
    %cst_9 = arith.constant dense<0.000000e+00> : vector<16x256xf32>
    %9 = tpu.matmul %7, %8, %cst_9 {dimension_numbers = #tpu.dot_dimension_numbers<[1], [0], [0], [1], [0, 0, 1, 1], [], []>} : vector<16x256xf32>, vector<256x256xf32>, vector<16x256xf32> -> vector<16x256xf32>
    %c0_10 = arith.constant 0 : index
    %c0_11 = arith.constant 0 : index
    %10 = vector.load %arg6[%c0_10, %c0_11] : memref<1x256xf32, #tpu.memory_space<vmem>>, vector<1x256xf32>
    %11 = vector.broadcast %10 : vector<1x256xf32> to vector<16x256xf32>
    %12 = arith.addf %9, %11 : vector<16x256xf32>
    %13 = math.tanh %12 : vector<16x256xf32>
    %c0_12 = arith.constant 0 : index
    %c0_13 = arith.constant 0 : index
    %14 = vector.load %arg7[%c0_12, %c0_13] : memref<256x256xf32, #tpu.memory_space<vmem>>, vector<256x256xf32>
    %cst_14 = arith.constant dense<0.000000e+00> : vector<16x256xf32>
    %15 = tpu.matmul %13, %14, %cst_14 {dimension_numbers = #tpu.dot_dimension_numbers<[1], [0], [0], [1], [0, 0, 1, 1], [], []>} : vector<16x256xf32>, vector<256x256xf32>, vector<16x256xf32> -> vector<16x256xf32>
    %c0_15 = arith.constant 0 : index
    %c0_16 = arith.constant 0 : index
    %16 = vector.load %arg8[%c0_15, %c0_16] : memref<1x256xf32, #tpu.memory_space<vmem>>, vector<1x256xf32>
    %17 = vector.broadcast %16 : vector<1x256xf32> to vector<16x256xf32>
    %18 = arith.addf %15, %17 : vector<16x256xf32>
    %19 = vector.extract_strided_slice %18 {offsets = [0, 0], sizes = [16, 128], strides = [1, 1]} : vector<16x256xf32> to vector<16x128xf32>
    %20 = vector.extract_strided_slice %18 {offsets = [0, 128], sizes = [16, 128], strides = [1, 1]} : vector<16x256xf32> to vector<16x128xf32>
    %cst_17 = arith.constant 5.000000e-01 : f32
    %21 = vector.broadcast %cst_17 : f32 to vector<16x128xf32>
    %22 = arith.mulf %21, %20 : vector<16x128xf32>
    %23 = math.exp %22 : vector<16x128xf32>
    %24 = arith.mulf %23, %1 : vector<16x128xf32>
    %25 = arith.addf %19, %24 : vector<16x128xf32>
    %c0_18 = arith.constant 0 : index
    %c0_19 = arith.constant 0 : index
    %26 = vector.load %arg9[%c0_18, %c0_19] : memref<128x384xf32, #tpu.memory_space<vmem>>, vector<128x384xf32>
    %cst_20 = arith.constant dense<0.000000e+00> : vector<16x384xf32>
    %27 = tpu.matmul %25, %26, %cst_20 {dimension_numbers = #tpu.dot_dimension_numbers<[1], [0], [0], [1], [0, 0, 1, 1], [], []>} : vector<16x128xf32>, vector<128x384xf32>, vector<16x384xf32> -> vector<16x384xf32>
    %c0_21 = arith.constant 0 : index
    %c0_22 = arith.constant 0 : index
    %28 = vector.load %arg10[%c0_21, %c0_22] : memref<1x384xf32, #tpu.memory_space<vmem>>, vector<1x384xf32>
    %29 = vector.broadcast %28 : vector<1x384xf32> to vector<16x384xf32>
    %30 = arith.addf %27, %29 : vector<16x384xf32>
    %31 = vector.extract_strided_slice %30 {offsets = [0, 0], sizes = [16, 256], strides = [1, 1]} : vector<16x384xf32> to vector<16x256xf32>
    %32 = math.tanh %31 : vector<16x256xf32>
    %33 = vector.extract_strided_slice %30 {offsets = [0, 256], sizes = [16, 128], strides = [1, 1]} : vector<16x384xf32> to vector<16x128xf32>
    %c0_23 = arith.constant 0 : index
    %c0_24 = arith.constant 0 : index
    %34 = vector.load %arg11[%c0_23, %c0_24] : memref<256x256xf32, #tpu.memory_space<vmem>>, vector<256x256xf32>
    %cst_25 = arith.constant dense<0.000000e+00> : vector<16x256xf32>
    %35 = tpu.matmul %32, %34, %cst_25 {dimension_numbers = #tpu.dot_dimension_numbers<[1], [0], [0], [1], [0, 0, 1, 1], [], []>} : vector<16x256xf32>, vector<256x256xf32>, vector<16x256xf32> -> vector<16x256xf32>
    %c0_26 = arith.constant 0 : index
    %c0_27 = arith.constant 0 : index
    %36 = vector.load %arg12[%c0_26, %c0_27] : memref<1x256xf32, #tpu.memory_space<vmem>>, vector<1x256xf32>
    %37 = vector.broadcast %36 : vector<1x256xf32> to vector<16x256xf32>
    %38 = arith.addf %35, %37 : vector<16x256xf32>
    %39 = math.tanh %38 : vector<16x256xf32>
    %c0_28 = arith.constant 0 : index
    %c0_29 = arith.constant 0 : index
    %40 = vector.load %arg13[%c0_28, %c0_29] : memref<256x256xf32, #tpu.memory_space<vmem>>, vector<256x256xf32>
    %cst_30 = arith.constant dense<0.000000e+00> : vector<16x256xf32>
    %41 = tpu.matmul %39, %40, %cst_30 {dimension_numbers = #tpu.dot_dimension_numbers<[1], [0], [0], [1], [0, 0, 1, 1], [], []>} : vector<16x256xf32>, vector<256x256xf32>, vector<16x256xf32> -> vector<16x256xf32>
    %c0_31 = arith.constant 0 : index
    %c0_32 = arith.constant 0 : index
    %42 = vector.load %arg14[%c0_31, %c0_32] : memref<1x256xf32, #tpu.memory_space<vmem>>, vector<1x256xf32>
    %43 = vector.broadcast %42 : vector<1x256xf32> to vector<16x256xf32>
    %44 = arith.addf %41, %43 : vector<16x256xf32>
    %45 = vector.extract_strided_slice %44 {offsets = [0, 0], sizes = [16, 128], strides = [1, 1]} : vector<16x256xf32> to vector<16x128xf32>
    %46 = arith.addf %45, %33 : vector<16x128xf32>
    %47 = vector.extract_strided_slice %44 {offsets = [0, 128], sizes = [16, 128], strides = [1, 1]} : vector<16x256xf32> to vector<16x128xf32>
    %48 = tpu.concatenate %46, %47, %25, %19, %20 in 1 : vector<16x128xf32>, vector<16x128xf32>, vector<16x128xf32>, vector<16x128xf32>, vector<16x128xf32> -> vector<16x640xf32>
    %c0_33 = arith.constant 0 : index
    %c0_34 = arith.constant 0 : index
    %49 = vector.load %arg15[%c0_33, %c0_34] : memref<16x640xf32, #tpu.memory_space<vmem>>, vector<16x640xf32>
    tpu.vector_store %arg15[%c0_33, %c0_34], %48 {strides = array<i32>} : memref<16x640xf32, #tpu.memory_space<vmem>>, vector<16x640xf32>,
    return
  }
  func.func @transform_0(%arg0: i32) -> (i32, i32) {
    %c0_i32 = arith.constant 0 : i32
    %c0_i32_0 = arith.constant 0 : i32
    return %arg0, %c0_i32 : i32, i32
  }
  func.func @transform_1(%arg0: i32) -> (i32, i32) {
    %c0_i32 = arith.constant 0 : i32
    %c0_i32_0 = arith.constant 0 : i32
    return %arg0, %c0_i32 : i32, i32
  }
  func.func @transform_2(%arg0: i32) -> (i32, i32) {
    %c0_i32 = arith.constant 0 : i32
    %c0_i32_0 = arith.constant 0 : i32
    %c0_i32_1 = arith.constant 0 : i32
    return %c0_i32, %c0_i32_0 : i32, i32
  }
  func.func @transform_3(%arg0: i32) -> (i32, i32) {
    %c0_i32 = arith.constant 0 : i32
    %c0_i32_0 = arith.constant 0 : i32
    %c0_i32_1 = arith.constant 0 : i32
    return %c0_i32, %c0_i32_0 : i32, i32
  }
  func.func @transform_4(%arg0: i32) -> (i32, i32) {
    %c0_i32 = arith.constant 0 : i32
    %c0_i32_0 = arith.constant 0 : i32
    %c0_i32_1 = arith.constant 0 : i32
    return %c0_i32, %c0_i32_0 : i32, i32
  }
  func.func @transform_5(%arg0: i32) -> (i32, i32) {
    %c0_i32 = arith.constant 0 : i32
    %c0_i32_0 = arith.constant 0 : i32
    %c0_i32_1 = arith.constant 0 : i32
    return %c0_i32, %c0_i32_0 : i32, i32
  }
  func.func @transform_6(%arg0: i32) -> (i32, i32) {
    %c0_i32 = arith.constant 0 : i32
    %c0_i32_0 = arith.constant 0 : i32
    %c0_i32_1 = arith.constant 0 : i32
    return %c0_i32, %c0_i32_0 : i32, i32
  }
  func.func @transform_7(%arg0: i32) -> (i32, i32) {
    %c0_i32 = arith.constant 0 : i32
    %c0_i32_0 = arith.constant 0 : i32
    %c0_i32_1 = arith.constant 0 : i32
    return %c0_i32, %c0_i32_0 : i32, i32
  }
  func.func @transform_8(%arg0: i32) -> (i32, i32) {
    %c0_i32 = arith.constant 0 : i32
    %c0_i32_0 = arith.constant 0 : i32
    %c0_i32_1 = arith.constant 0 : i32
    return %c0_i32, %c0_i32_0 : i32, i32
  }
  func.func @transform_9(%arg0: i32) -> (i32, i32) {
    %c0_i32 = arith.constant 0 : i32
    %c0_i32_0 = arith.constant 0 : i32
    %c0_i32_1 = arith.constant 0 : i32
    return %c0_i32, %c0_i32_0 : i32, i32
  }
  func.func @transform_10(%arg0: i32) -> (i32, i32) {
    %c0_i32 = arith.constant 0 : i32
    %c0_i32_0 = arith.constant 0 : i32
    %c0_i32_1 = arith.constant 0 : i32
    return %c0_i32, %c0_i32_0 : i32, i32
  }
  func.func @transform_11(%arg0: i32) -> (i32, i32) {
    %c0_i32 = arith.constant 0 : i32
    %c0_i32_0 = arith.constant 0 : i32
    %c0_i32_1 = arith.constant 0 : i32
    return %c0_i32, %c0_i32_0 : i32, i32
  }
  func.func @transform_12(%arg0: i32) -> (i32, i32) {
    %c0_i32 = arith.constant 0 : i32
    %c0_i32_0 = arith.constant 0 : i32
    %c0_i32_1 = arith.constant 0 : i32
    return %c0_i32, %c0_i32_0 : i32, i32
  }
  func.func @transform_13(%arg0: i32) -> (i32, i32) {
    %c0_i32 = arith.constant 0 : i32
    %c0_i32_0 = arith.constant 0 : i32
    %c0_i32_1 = arith.constant 0 : i32
    return %c0_i32, %c0_i32_0 : i32, i32
  }
  func.func @transform_14(%arg0: i32) -> (i32, i32) {
    %c0_i32 = arith.constant 0 : i32
    %c0_i32_0 = arith.constant 0 : i32
    return %arg0, %c0_i32 : i32, i32
  }
}

</mosaic_0001>

<bundles_post_ra>
// kernel: tpu_custom_call.1
= control target key start
LH: loop header
LB: loop body
LE: loop exit
PB: predicated region body
PF: predicated region fallthrough
CT: control target
= control target key end

     0   :  { %19 = vsyncpa [#allocation3], 0  ;;  %s2078_s0 = inlined_call_operand.hbm [shape: f32[16,32], index: 0, kind: input, shape index: {}]   ;;  %s2079_s1 = inlined_call_operand.hbm [shape: f32[16,128], index: 1, kind: input, shape index: {}]   ;;  %s2080_s2 = inlined_call_operand.hbm [shape: f32[32,256], index: 2, kind: input, shape index: {}]   ;;  %s2081_s3 = inlined_call_operand.vmem [shape: f32[1,256], index: 3, kind: input, shape index: {}]   ;;  %s2082_s4 = inlined_call_operand.hbm [shape: f32[256,256], index: 4, kind: input, shape index: {}]   ;;  %s2083_s5 = inlined_call_operand.vmem [shape: f32[1,256], index: 5, kind: input, shape index: {}]   ;;  %s2084_s6 = inlined_call_operand.hbm [shape: f32[256,256], index: 6, kind: input, shape index: {}]   ;;  %s2085_s7 = inlined_call_operand.vmem [shape: f32[1,256], index: 7, kind: input, shape index: {}]   ;;  %s2086_s8 = inlined_call_operand.hbm [shape: f32[128,384], index: 8, kind: input, shape index: {}]   ;;  %s2087_s9 = inlined_call_operand.vmem [shape: f32[1,384], index: 9, kind: input, shape index: {}]   ;;  %s2088_s10 = inlined_call_operand.hbm [shape: f32[256,256], index: 10, kind: input, shape index: {}]   ;;  %s2089_s11 = inlined_call_operand.vmem [shape: f32[1,256], index: 11, kind: input, shape index: {}]   ;;  %s2090_s12 = inlined_call_operand.hbm [shape: f32[256,256], index: 12, kind: input, shape index: {}]   ;;  %s2091_s13 = inlined_call_operand.vmem [shape: f32[1,256], index: 13, kind: input, shape index: {}]   ;;  %s2092_s14 = inlined_call_operand.hbm [shape: f32[16,640], index: 14, kind: output, shape index: {}]  }
   0x1   :  { %20 = vsyncpa [#allocation6], 0 }
   0x2   :  { %21 = vsyncpa [#allocation9], 0 }
   0x3   :  { %22 = vsyncpa [#allocation12], 0 }
   0x4   :  { %23 = vsyncpa [#allocation15], 0 }
   0x5   :  { %24 = vsyncpa [#allocation4], 0  ;;  %s1800_s29 = smov [#allocation5]   ;;  %s1590_s17 = scalar_lea.hbm %s2079_s1, 256 }
   0x6   :  { %s42_s30 = sshll.u32 %s1800_s29, 4  ;;  %p1591_p0 = scmp.ne.s32.totalorder %s2079_s1, %s1590_s17  ;;  %s43_s30 = int_to_ptr.vmem [resolvable:$true] %s42_s30 }
   0x7   :  { %p1594_p1 = scmp.lt.u32.totalorder %s1590_s17, %s2079_s1 }
   0x9   :  { %p1596_p2 = pnand %p1594_p1, %p1591_p0 }
   0xb   :  { %1599 = shalt.err (!%p1596_p2)
}
   0xc   :  { %s1600_s22 = scalar_lea.vmem %s43_s30, 256  ;;  %p1605_p4 = scmp.lt.s32.totalorder %s43_s30, %s43_s30 }
   0xd   :  { %p1601_p3 = scmp.ne.s32.totalorder %s43_s30, %s1600_s22  ;;  %p1606_p5 = scmp.lt.s32.totalorder %s1600_s22, %s1600_s22 }
   0xf   :  { %p1607_p6 = por %p1606_p5, %p1605_p4 }
  0x11   :  { %p1608_p7 = pnand %p1607_p6, %p1601_p3 }
  0x13   :  { %1611 = shalt.err (!%p1608_p7)
}
  0x14   :  { %s1801_s23 = smov 128   ;;  %s1802_s24 = smov 8  }
  0x15   :  { %48 = dma.hbm_to_vmem [thread:$0]  %s2079_s1, 256, %s43_s30, [#allocation6], %s1801_s23, %s1801_s23, %s1802_s24  }
  0x16   :  { %s1803_s27 = smov [#allocation8]   ;;  %s1804_s29 = smov [#allocation11]  }
  0x17   :  { %s68_s28 = sshll.u32 %s1803_s27, 4  ;;  %s96_s15 = sshll.u32 %s1804_s29, 4  ;;  %s69_s28 = int_to_ptr.vmem [resolvable:$true] %s68_s28  ;;  %s97_s15 = int_to_ptr.vmem [resolvable:$true] %s96_s15 }
  0x18   :  { %s1612_s18 = scalar_lea.hbm %s2082_s4, 8192 }
  0x19   :  { %p1613_p8 = scmp.ne.s32.totalorder %s2082_s4, %s1612_s18  ;;  %p1616_p9 = scmp.lt.u32.totalorder %s1612_s18, %s2082_s4 }
  0x1b   :  { %p1618_p10 = pnand %p1616_p9, %p1613_p8 }
  0x1d   :  { %1621 = shalt.err (!%p1618_p10)
}
  0x1e   :  { %s1622_s1 = scalar_lea.vmem %s69_s28, 8192  ;;  %p1627_p12 = scmp.lt.s32.totalorder %s69_s28, %s69_s28 }
  0x1f   :  { %p1623_p11 = scmp.ne.s32.totalorder %s69_s28, %s1622_s1  ;;  %p1628_p13 = scmp.lt.s32.totalorder %s1622_s1, %s1622_s1 }
  0x21   :  { %p1629_p0 = por %p1628_p13, %p1627_p12 }
  0x23   :  { %p1630_p1 = pnand %p1629_p0, %p1623_p11 }
  0x25   :  { %1633 = shalt.err (!%p1630_p1)
}
  0x26   :  { %s2093_s30 = smov 256   ;;  %s2095_s25 = smov 16  }
  0x27   :  { %74 = dma.hbm_to_vmem [thread:$0]  %s2082_s4, 8192, %s69_s28, [#allocation9], %s2093_s30, %s2093_s30, %s2095_s25  }
  0x28   :  { %s1634_s17 = scalar_lea.hbm %s2086_s8, 6144 }
  0x29   :  { %p1635_p2 = scmp.ne.s32.totalorder %s2086_s8, %s1634_s17  ;;  %p1638_p3 = scmp.lt.u32.totalorder %s1634_s17, %s2086_s8 }
  0x2b   :  { %p1640_p4 = pnand %p1638_p3, %p1635_p2 }
  0x2d   :  { %1643 = shalt.err (!%p1640_p4)
}
  0x2e   :  { %s1644_s22 = scalar_lea.vmem %s97_s15, 6144  ;;  %p1649_p6 = scmp.lt.s32.totalorder %s97_s15, %s97_s15 }
  0x2f   :  { %p1645_p5 = scmp.ne.s32.totalorder %s97_s15, %s1644_s22  ;;  %p1650_p7 = scmp.lt.s32.totalorder %s1644_s22, %s1644_s22 }
  0x31   :  { %p1651_p8 = por %p1650_p7, %p1649_p6 }
  0x33   :  { %p1652_p9 = pnand %p1651_p8, %p1645_p5 }
  0x35   :  { %1655 = shalt.err (!%p1652_p9)
}
  0x36   :  { %s1807_s4 = smov 384   ;;  %s1808_s28 = smov 24  }
  0x37   :  { %102 = dma.hbm_to_vmem [thread:$0]  %s2086_s8, 6144, %s97_s15, [#allocation12], %s1807_s4, %s1807_s4, %s1808_s28  }
  0x38   :  { %s1809_s27 = smov [#allocation2]   ;;  %s1810_s16 = smov [#allocation7]  }
  0x39   :  { %s30_s29 = sshll.u32 %s1809_s27, 4  ;;  %s54_s17 = sshll.u32 %s1810_s16, 4  ;;  %s31_s29 = int_to_ptr.vmem [resolvable:$true] %s30_s29  ;;  %s55_s17 = int_to_ptr.vmem [resolvable:$true] %s54_s17 }
  0x3a   :  { %s1656_s20 = scalar_lea.hbm %s2078_s0, 256 }
  0x3b   :  { %p1657_p10 = scmp.ne.s32.totalorder %s2078_s0, %s1656_s20  ;;  %p1660_p11 = scmp.lt.u32.totalorder %s1656_s20, %s2078_s0 }
  0x3d   :  { %p1662_p12 = pnand %p1660_p11, %p1657_p10 }
  0x3f   :  { %1665 = shalt.err (!%p1662_p12)
}
  0x40   :  { %s1666_s8 = scalar_lea.vmem %s31_s29, 256  ;;  %p1671_p0 = scmp.lt.s32.totalorder %s31_s29, %s31_s29 }
  0x41   :  { %p1667_p13 = scmp.ne.s32.totalorder %s31_s29, %s1666_s8  ;;  %p1672_p1 = scmp.lt.s32.totalorder %s1666_s8, %s1666_s8 }
  0x43   :  { %p1673_p2 = por %p1672_p1, %p1671_p0 }
  0x45   :  { %p1674_p3 = pnand %p1673_p2, %p1667_p13 }
  0x47   :  { %1677 = shalt.err (!%p1674_p3)
}
  0x48   :  { %36 = dma.hbm_to_vmem [thread:$0]  %s2078_s0, 256, %s31_s29, [#allocation3], %s1801_s23, %s1801_s23, %s1802_s24  }
  0x49   :  { %s1678_s25 = scalar_lea.hbm %s2080_s2, 1024 }
  0x4a   :  { %p1679_p4 = scmp.ne.s32.totalorder %s2080_s2, %s1678_s25  ;;  %p1682_p5 = scmp.lt.u32.totalorder %s1678_s25, %s2080_s2 }
  0x4c   :  { %p1684_p6 = pnand %p1682_p5, %p1679_p4 }
  0x4e   :  { %1687 = shalt.err (!%p1684_p6)
}
  0x4f   :  { %s1688_s18 = scalar_lea.vmem %s55_s17, 1024  ;;  %p1693_p8 = scmp.lt.s32.totalorder %s55_s17, %s55_s17 }
  0x50   :  { %p1689_p7 = scmp.ne.s32.totalorder %s55_s17, %s1688_s18  ;;  %p1694_p9 = scmp.lt.s32.totalorder %s1688_s18, %s1688_s18 }
  0x52   :  { %p1695_p10 = por %p1694_p9, %p1693_p8 }
  0x54   :  { %p1696_p11 = pnand %p1695_p10, %p1689_p7 }
  0x56   :  { %1699 = shalt.err (!%p1696_p11)
}
  0x57   :  { %s2097_s0 = smov 16   ;;  %s2098_s23 = smov 256  }
  0x58   :  { %60 = dma.hbm_to_vmem [thread:$0]  %s2080_s2, 1024, %s55_s17, [#allocation6], %s2098_s23, %s2098_s23, %s2097_s0  }
  0x59   :  { %s1811_s19 = smov [#allocation10]   ;;  %s1812_s21 = smov [#allocation13]  }
  0x5a   :  { %s82_s20 = sshll.u32 %s1811_s19, 4  ;;  %s110_s22 = sshll.u32 %s1812_s21, 4  ;;  %s83_s20 = int_to_ptr.vmem [resolvable:$true] %s82_s20  ;;  %s111_s22 = int_to_ptr.vmem [resolvable:$true] %s110_s22 }
  0x5b   :  { %s1700_s4 = scalar_lea.hbm %s2084_s6, 8192 }
  0x5c   :  { %p1701_p12 = scmp.ne.s32.totalorder %s2084_s6, %s1700_s4  ;;  %p1704_p13 = scmp.lt.u32.totalorder %s1700_s4, %s2084_s6 }
  0x5e   :  { %p1706_p0 = pnand %p1704_p13, %p1701_p12 }
  0x60   :  { %1709 = shalt.err (!%p1706_p0)
}
  0x61   :  { %s1710_s2 = scalar_lea.vmem %s83_s20, 8192  ;;  %p1715_p2 = scmp.lt.s32.totalorder %s83_s20, %s83_s20 }
  0x62   :  { %p1711_p1 = scmp.ne.s32.totalorder %s83_s20, %s1710_s2  ;;  %p1716_p3 = scmp.lt.s32.totalorder %s1710_s2, %s1710_s2 }
  0x64   :  { %p1717_p4 = por %p1716_p3, %p1715_p2 }
  0x66   :  { %p1718_p5 = pnand %p1717_p4, %p1711_p1 }
  0x68   :  { %1721 = shalt.err (!%p1718_p5)
}
  0x69   :  { %88 = dma.hbm_to_vmem [thread:$0]  %s2084_s6, 8192, %s83_s20, [#allocation9], %s2098_s23, %s2098_s23, %s2097_s0  }
  0x6a   :  { %s1722_s18 = scalar_lea.hbm %s2088_s10, 8192 }
  0x6b   :  { %p1723_p6 = scmp.ne.s32.totalorder %s2088_s10, %s1722_s18  ;;  %p1726_p7 = scmp.lt.u32.totalorder %s1722_s18, %s2088_s10 }
  0x6d   :  { %p1728_p8 = pnand %p1726_p7, %p1723_p6 }
  0x6f   :  { %1731 = shalt.err (!%p1728_p8)
}
  0x70   :  { %s1732_s8 = scalar_lea.vmem %s111_s22, 8192  ;;  %p1737_p10 = scmp.lt.s32.totalorder %s111_s22, %s111_s22 }
  0x71   :  { %p1733_p9 = scmp.ne.s32.totalorder %s111_s22, %s1732_s8  ;;  %p1738_p11 = scmp.lt.s32.totalorder %s1732_s8, %s1732_s8 }
  0x73   :  { %p1739_p12 = por %p1738_p11, %p1737_p10 }
  0x75   :  { %p1740_p13 = pnand %p1739_p12, %p1733_p9 }
  0x77   :  { %1743 = shalt.err (!%p1740_p13)
}
  0x78   :  { %116 = dma.hbm_to_vmem [thread:$0]  %s2088_s10, 8192, %s111_s22, [#allocation12], %s2098_s23, %s2098_s23, %s2097_s0  }
  0x79   :  { %s1813_s15 = smov [#allocation14]   ;;  %s1744_s25 = scalar_lea.hbm %s2090_s12, 8192 }
  0x7a   :  { %s124_s4 = sshll.u32 %s1813_s15, 4  ;;  %p1745_p0 = scmp.ne.s32.totalorder %s2090_s12, %s1744_s25  ;;  %s125_s4 = int_to_ptr.vmem [resolvable:$true] %s124_s4 }
  0x7b   :  { %p1748_p1 = scmp.lt.u32.totalorder %s1744_s25, %s2090_s12 }
  0x7d   :  { %p1750_p2 = pnand %p1748_p1, %p1745_p0 }
  0x7f   :  { %1753 = shalt.err (!%p1750_p2)
}
  0x80   :  { %s1754_s27 = scalar_lea.vmem %s125_s4, 8192  ;;  %p1759_p4 = scmp.lt.s32.totalorder %s125_s4, %s125_s4 }
  0x81   :  { %p1755_p3 = scmp.ne.s32.totalorder %s125_s4, %s1754_s27  ;;  %p1760_p5 = scmp.lt.s32.totalorder %s1754_s27, %s1754_s27 }
  0x83   :  { %p1761_p6 = por %p1760_p5, %p1759_p4 }
  0x85   :  { %p1762_p7 = pnand %p1761_p6, %p1755_p3 }
  0x87   :  { %1765 = shalt.err (!%p1762_p7)
}
  0x88   :  { %130 = dma.hbm_to_vmem [thread:$0]  %s2090_s12, 8192, %s125_s4, [#allocation15], %s2098_s23, %s2098_s23, %s2097_s0  }
  0x89   :  { %1788 = dma.done.wait [#allocation3], 256  }
  0x8a   :  { %1789 = vsyncadd [#allocation3], 4294967040 }
  0x8b   :  { %1790 = dma.done.wait [#allocation6], 1280  }
  0x8c   :  { %1791 = vsyncadd [#allocation6], 4294966016 }
  0x8d   :  { %1792 = dma.done.wait [#allocation9], 16384  }
  0x8e   :  { %1793 = vsyncadd [#allocation9], 4294950912 }
  0x8f   :  { %1794 = dma.done.wait [#allocation12], 14336  }
  0x90   :  { %1795 = vsyncadd [#allocation12], 4294952960 }
  0x91   :  { %1796 = dma.done.wait [#allocation15], 8192  }
  0x92   :  { %1797 = vsyncadd [#allocation15], 4294959104  ;;  %v1814_v0 = vmov 0.0   ;;  %v162_v1 = vld [vmem:[#allocation7 + $0x8] sm:$0xff]  ;;  %v164_v2 = vld [vmem:[#allocation7 + $0x18] sm:$0xff]  ;;  %vm181_vm0 = vcmask 261120  }
  0x93   :  { %252 = vmatprep.mubr.f32.mxu0 %v1814_v0  ;;  %v161_v3 = vld [vmem:[#allocation7] sm:$0xff]  ;;  %v1208_v4 = vpack.c.bf16 %v164_v2, %v162_v1  ;;  %v163_v5 = vld [vmem:[#allocation7 + $0x10] sm:$0xff]  ;;  %v166_v6 = vld [vmem:[#allocation7 + $0x28] sm:$0xff]  ;;  %s1815_s19 = smov [#allocation16]  }
  0x94   :  { %v168_v7 = vld [vmem:[#allocation7 + $0x38] sm:$0xff]  ;;  %v1210_v8 = vpack.c.bf16 %v163_v5, %v161_v3  ;;  %v165_v10 = vld [vmem:[#allocation7 + $0x20] sm:$0xff]  ;;  %v167_v11 = vld [vmem:[#allocation7 + $0x30] sm:$0xff]  ;;  %s1137_s21 = sshll.u32 %s1815_s19, 4  ;;  %s1138_s21 = int_to_ptr.vmem [resolvable:$true] %s1137_s21 }
  0x95   :  { %v1212_v9 = vpack.c.bf16 %v168_v7, %v166_v6  ;;  %1209 = vmatprep.subr.bf16.mxu0 %v1208_v4  ;;  %v270_v12 = vld [vmem:[#allocation8 + $0x8] sm:$0xff]  ;;  %v272_v13 = vld [vmem:[#allocation8 + $0x18] sm:$0xff]  ;;  %v1214_v14 = vpack.c.bf16 %v167_v11, %v165_v10  ;;  %v269_v16 = vld [vmem:[#allocation8] sm:$0xff]  ;;  %p1771_p9 = scmp.lt.s32.totalorder %s1138_s21, %s1138_s21 }
  0x96   :  { %1211 = vmatpush1.bf16.msra.mxu0 %v1210_v8  ;;  %v1216_v15 = vpack.c.bf16 %v272_v13, %v270_v12  ;;  %v271_v17 = vld [vmem:[#allocation8 + $0x10] sm:$0xff]  ;;  %v274_v18 = vld [vmem:[#allocation8 + $0x28] sm:$0xff]  ;;  %v276_v20 = vld [vmem:[#allocation8 + $0x38] sm:$0xff] }
  0x97   :  { %1213 = vmatprep.subr.bf16.mxu0 %v1212_v9  ;;  %v1218_v19 = vpack.c.bf16 %v271_v17, %v269_v16  ;;  %v273_v21 = vld [vmem:[#allocation8 + $0x20] sm:$0xff]  ;;  %v275_v22 = vld [vmem:[#allocation8 + $0x30] sm:$0xff]  ;;  %v1220_v23 = vpack.c.bf16 %v276_v20, %v274_v18  ;;  %v278_v24 = vld [vmem:[#allocation8 + $0x48] sm:$0xff] }
  0x98   :  { %1217 = vmatprep.subr.bf16.mxu1 %v1216_v15  ;;  %v280_v25 = vld [vmem:[#allocation8 + $0x58] sm:$0xff]  ;;  %v1222_v26 = vpack.c.bf16 %v275_v22, %v273_v21  ;;  %v157_v27 = vld [vmem:[#allocation2] sm:$0xff]  ;;  %v279_v30 = vld [vmem:[#allocation8 + $0x50] sm:$0xff] }
  0x99   :  { %1219 = vmatpush1.bf16.msra.mxu1 %v1218_v19  ;;  %v1224_v28 = vpack.c.bf16 %v280_v25, %v278_v24  ;;  %v277_v29 = vld [vmem:[#allocation8 + $0x40] sm:$0xff]  ;;  %v282_v31 = vld [vmem:[#allocation8 + $0x68] sm:$0xff]  ;;  %v284_v32 = vld [vmem:[#allocation8 + $0x78] sm:$0xff] }
  0x9a   :  { %1215 = vmatpush1.bf16.msra.mxu0 %v1214_v14  ;;  %1221 = vmatprep.subr.bf16.mxu1 %v1220_v23  ;;  %v1226_v33 = vpack.c.bf16 %v279_v30, %v277_v29  ;;  %v158_v34 = vld [vmem:[#allocation2 + $0x8] sm:$0xff]  ;;  %v1228_v35 = vpack.c.bf16 %v284_v32, %v282_v31  ;;  %v281_v36 = vld [vmem:[#allocation8 + $0x60] sm:$0xff]  ;;  %v283_v37 = vld [vmem:[#allocation8 + $0x70] sm:$0xff] }
  0x9b   :  { %v286_v38 = vld [vmem:[#allocation8 + $0x88] sm:$0xff]  ;;  %v288_v39 = vld [vmem:[#allocation8 + $0x98] sm:$0xff]  ;;  %v1230_v40 = vpack.c.bf16 %v283_v37, %v281_v36  ;;  %v285_v42 = vld [vmem:[#allocation8 + $0x80] sm:$0xff] }
  0x9c   :  { %v1232_v41 = vpack.c.bf16 %v288_v39, %v286_v38  ;;  %v287_v43 = vld [vmem:[#allocation8 + $0x90] sm:$0xff]  ;;  %v290_v44 = vld [vmem:[#allocation8 + $0xa8] sm:$0xff]  ;;  %v292_v45 = vld [vmem:[#allocation8 + $0xb8] sm:$0xff] }
  0x9d   :  { %1153 = vmatmul.mubr.msk.f32.vlgmr.msra.gmra.mrb[0].mxu0 %vm181_vm0, %v157_v27  ;;  %1223 = vmatpush1.bf16.msra.mxu1 %v1222_v26  ;;  %v1234_v46 = vpack.c.bf16 %v287_v43, %v285_v42  ;;  %v1236_v47 = vpack.c.bf16 %v292_v45, %v290_v44  ;;  %v289_v48 = vld [vmem:[#allocation8 + $0xa0] sm:$0xff]  ;;  %v291_v49 = vld [vmem:[#allocation8 + $0xb0] sm:$0xff]  ;;  %v294_v50 = vld [vmem:[#allocation8 + $0xc8] sm:$0xff] }
  0x9e   :  { %258 = vmatprep.mubr.f32.mxu0 %v1814_v0  ;;  %1225 = vmatprep.subr.bf16.mxu1 %v1224_v28  ;;  %v296_v51 = vld [vmem:[#allocation8 + $0xd8] sm:$0xff]  ;;  %v1238_v52 = vpack.c.bf16 %v291_v49, %v289_v48  ;;  %v293_v54 = vld [vmem:[#allocation8 + $0xc0] sm:$0xff]  ;;  %v295_v55 = vld [vmem:[#allocation8 + $0xd0] sm:$0xff] }
  0x9f   :  { %v1240_v53 = vpack.c.bf16 %v296_v51, %v294_v50  ;;  %v298_v56 = vld [vmem:[#allocation8 + $0xe8] sm:$0xff]  ;;  %v300_v57 = vld [vmem:[#allocation8 + $0xf8] sm:$0xff]  ;;  %v1242_v58 = vpack.c.bf16 %v295_v55, %v293_v54  ;;  %v297_v60 = vld [vmem:[#allocation8 + $0xe0] sm:$0xff] }
  0xa0   :  { %v1244_v59 = vpack.c.bf16 %v300_v57, %v298_v56  ;;  %v299_v61 = vld [vmem:[#allocation8 + $0xf0] sm:$0xff]  ;;  %v302_v62 = vld [vmem:[#allocation8 + $0x108] sm:$0xff]  ;;  %v304_v63 = vld [vmem:[#allocation8 + $0x118] sm:$0xff] }
  0xa1   :  { %1154 = vmatmul.mubr.msk.f32.gmra.mrb[2].mxu0 %vm181_vm0, %v158_v34  ;;  %1227 = vmatpush1.bf16.msra.mxu1 %v1226_v33  ;;  %v1246_v1 = vpack.c.bf16 %v299_v61, %v297_v60  ;;  %v1248_v2 = vpack.c.bf16 %v304_v63, %v302_v62  ;;  %v301_v3 = vld [vmem:[#allocation8 + $0x100] sm:$0xff]  ;;  %v303_v4 = vld [vmem:[#allocation8 + $0x110] sm:$0xff]  ;;  %v306_v5 = vld [vmem:[#allocation8 + $0x128] sm:$0xff] }
  0xa2   :  { %1229 = vmatprep.subr.bf16.mxu1 %v1228_v35  ;;  %v308_v6 = vld [vmem:[#allocation8 + $0x138] sm:$0xff]  ;;  %v1250_v7 = vpack.c.bf16 %v303_v4, %v301_v3  ;;  %v305_v9 = vld [vmem:[#allocation8 + $0x120] sm:$0xff]  ;;  %v307_v10 = vld [vmem:[#allocation8 + $0x130] sm:$0xff] }
  0xa3   :  { %v1252_v8 = vpack.c.bf16 %v308_v6, %v306_v5  ;;  %v310_v11 = vld [vmem:[#allocation8 + $0x148] sm:$0xff]  ;;  %v312_v12 = vld [vmem:[#allocation8 + $0x158] sm:$0xff]  ;;  %v1254_v13 = vpack.c.bf16 %v307_v10, %v305_v9  ;;  %v309_v15 = vld [vmem:[#allocation8 + $0x140] sm:$0xff] }
  0xa4   :  { %v1256_v14 = vpack.c.bf16 %v312_v12, %v310_v11  ;;  %v311_v16 = vld [vmem:[#allocation8 + $0x150] sm:$0xff]  ;;  %v314_v17 = vld [vmem:[#allocation8 + $0x168] sm:$0xff]  ;;  %v316_v18 = vld [vmem:[#allocation8 + $0x178] sm:$0xff] }
  0xa5   :  { %1231 = vmatpush1.bf16.msra.mxu1 %v1230_v40  ;;  %v1258_v19 = vpack.c.bf16 %v311_v16, %v309_v15  ;;  %v1260_v20 = vpack.c.bf16 %v316_v18, %v314_v17  ;;  %v313_v21 = vld [vmem:[#allocation8 + $0x160] sm:$0xff]  ;;  %v315_v22 = vld [vmem:[#allocation8 + $0x170] sm:$0xff]  ;;  %v318_v24 = vld [vmem:[#allocation8 + $0x188] sm:$0xff] }
  0xa6   :  { %1233 = vmatprep.subr.bf16.mxu1 %v1232_v41  ;;  %v1262_v23 = vpack.c.bf16 %v315_v22, %v313_v21  ;;  %v320_v25 = vld [vmem:[#allocation8 + $0x198] sm:$0xff]  ;;  %v317_v27 = vld [vmem:[#allocation8 + $0x180] sm:$0xff]  ;;  %v319_v28 = vld [vmem:[#allocation8 + $0x190] sm:$0xff] }
  0xa7   :  { %v1264_v26 = vpack.c.bf16 %v320_v25, %v318_v24  ;;  %v1266_v29 = vpack.c.bf16 %v319_v28, %v317_v27  ;;  %v322_v30 = vld [vmem:[#allocation8 + $0x1a8] sm:$0xff]  ;;  %v324_v31 = vld [vmem:[#allocation8 + $0x1b8] sm:$0xff]  ;;  %v321_v33 = vld [vmem:[#allocation8 + $0x1a0] sm:$0xff] }
  0xa8   :  { %v1268_v32 = vpack.c.bf16 %v324_v31, %v322_v30  ;;  %v323_v34 = vld [vmem:[#allocation8 + $0x1b0] sm:$0xff]  ;;  %v326_v36 = vld [vmem:[#allocation8 + $0x1c8] sm:$0xff]  ;;  %v328_v37 = vld [vmem:[#allocation8 + $0x1d8] sm:$0xff] }
  0xa9   :  { %1235 = vmatpush1.bf16.msra.mxu1 %v1234_v46  ;;  %v1270_v35 = vpack.c.bf16 %v323_v34, %v321_v33  ;;  %v1272_v38 = vpack.c.bf16 %v328_v37, %v326_v36  ;;  %v325_v39 = vld [vmem:[#allocation8 + $0x1c0] sm:$0xff]  ;;  %v327_v40 = vld [vmem:[#allocation8 + $0x1d0] sm:$0xff]  ;;  %v330_v42 = vld [vmem:[#allocation8 + $0x1e8] sm:$0xff] }
  0xaa   :  { %1237 = vmatprep.subr.bf16.mxu1 %v1236_v47  ;;  %v1274_v41 = vpack.c.bf16 %v327_v40, %v325_v39  ;;  %v332_v43 = vld [vmem:[#allocation8 + $0x1f8] sm:$0xff]  ;;  %v329_v44 = vld [vmem:[#allocation8 + $0x1e0] sm:$0xff]  ;;  %v331_v46 = vld [vmem:[#allocation8 + $0x1f0] sm:$0xff] }
  0xab   :  { %v1276_v45 = vpack.c.bf16 %v332_v43, %v330_v42  ;;  %v1278_v47 = vpack.c.bf16 %v331_v46, %v329_v44  ;;  %v427_v48 = vld [vmem:[#allocation10 + $0x8] sm:$0xff]  ;;  %v429_v49 = vld [vmem:[#allocation10 + $0x18] sm:$0xff]  ;;  %v426_v50 = vld [vmem:[#allocation10] sm:$0xff] }
  0xac   :  { %v1280_v51 = vpack.c.bf16 %v429_v49, %v427_v48  ;;  %v433_v54 = vld [vmem:[#allocation10 + $0x38] sm:$0xff]  ;;  %v430_v57 = vld [vmem:[#allocation10 + $0x20] sm:$0xff]  ;;  %v452_v25 = vld [vmem:[#allocation10 + $0xd0] sm:$0xff] }
  0xad   :  { %1239 = vmatpush1.bf16.msra.mxu1 %v1238_v52  ;;  %v428_v52 = vld [vmem:[#allocation10 + $0x10] sm:$0xff]  ;;  %v437_v60 = vld [vmem:[#allocation10 + $0x58] sm:$0xff]  ;;  %v434_v63 = vld [vmem:[#allocation10 + $0x40] sm:$0xff] }
  0xae   :  { %1241 = vmatprep.subr.bf16.mxu1 %v1240_v53  ;;  %v431_v53 = vld [vmem:[#allocation10 + $0x28] sm:$0xff]  ;;  %v1282_v55 = vpack.c.bf16 %v428_v52, %v426_v50  ;;  %1281 = vmatprep.subr.bf16.mxu0 %v1280_v51  ;;  %v441_v3 = vld [vmem:[#allocation10 + $0x78] sm:$0xff]  ;;  %v438_v6 = vld [vmem:[#allocation10 + $0x60] sm:$0xff] }
  0xaf   :  { %v1284_v56 = vpack.c.bf16 %v433_v54, %v431_v53  ;;  %v445_v9 = vld [vmem:[#allocation10 + $0x98] sm:$0xff]  ;;  %v442_v12 = vld [vmem:[#allocation10 + $0x80] sm:$0xff]  ;;  %v456_v31 = vld [vmem:[#allocation10 + $0xf0] sm:$0xff] }
  0xb0   :  { %1283 = vmatpush1.bf16.msra.mxu0 %v1282_v55  ;;  %v449_v15 = vld [vmem:[#allocation10 + $0xb8] sm:$0xff]  ;;  %v446_v18 = vld [vmem:[#allocation10 + $0xa0] sm:$0xff]  ;;  %v460_v37 = vld [vmem:[#allocation10 + $0x110] sm:$0xff] }
  0xb1   :  { %1243 = vmatpush1.bf16.msra.mxu1 %v1242_v58  ;;  %v432_v58 = vld [vmem:[#allocation10 + $0x30] sm:$0xff]  ;;  %1285 = vmatprep.subr.bf16.mxu0 %v1284_v56  ;;  %v453_v21 = vld [vmem:[#allocation10 + $0xd8] sm:$0xff]  ;;  %v450_v24 = vld [vmem:[#allocation10 + $0xc0] sm:$0xff] }
  0xb2   :  { %1245 = vmatprep.subr.bf16.mxu1 %v1244_v59  ;;  %v435_v59 = vld [vmem:[#allocation10 + $0x48] sm:$0xff]  ;;  %v1286_v61 = vpack.c.bf16 %v432_v58, %v430_v57  ;;  %v457_v27 = vld [vmem:[#allocation10 + $0xf8] sm:$0xff]  ;;  %v1306_v28 = vpack.c.bf16 %v452_v25, %v450_v24  ;;  %v454_v30 = vld [vmem:[#allocation10 + $0xe0] sm:$0xff]  ;;  %v171_v57 = vlaneseq }
  0xb3   :  { %v1288_v62 = vpack.c.bf16 %v437_v60, %v435_v59  ;;  %v461_v33 = vld [vmem:[#allocation10 + $0x118] sm:$0xff]  ;;  %v1310_v34 = vpack.c.bf16 %v456_v31, %v454_v30  ;;  %v458_v36 = vld [vmem:[#allocation10 + $0x100] sm:$0xff]  ;;  %v464_v43 = vld [vmem:[#allocation10 + $0x130] sm:$0xff] }
  0xb4   :  { %1287 = vmatpush1.bf16.msra.mxu0 %v1286_v61  ;;  %v465_v39 = vld [vmem:[#allocation10 + $0x138] sm:$0xff]  ;;  %v1314_v40 = vpack.c.bf16 %v460_v37, %v458_v36  ;;  %v462_v42 = vld [vmem:[#allocation10 + $0x120] sm:$0xff]  ;;  %v467_v44 = vld [vmem:[#allocation10 + $0x148] sm:$0xff]  ;;  %v2014_v58 = vshrl.u32 %v171_v57, 7 }
  0xb5   :  { %1247 = vmatpush1.bf16.msra.mxu1 %v1246_v1  ;;  %v436_v1 = vld [vmem:[#allocation10 + $0x50] sm:$0xff]  ;;  %1289 = vmatprep.subr.bf16.mxu0 %v1288_v62  ;;  %v1318_v46 = vpack.c.bf16 %v464_v43, %v462_v42  ;;  %v466_v48 = vld [vmem:[#allocation10 + $0x140] sm:$0xff]  ;;  %v471_v50 = vld [vmem:[#allocation10 + $0x168] sm:$0xff] }
  0xb6   :  { %1249 = vmatprep.subr.bf16.mxu1 %v1248_v2  ;;  %v439_v2 = vld [vmem:[#allocation10 + $0x68] sm:$0xff]  ;;  %v1290_v4 = vpack.c.bf16 %v436_v1, %v434_v63  ;;  %v468_v49 = vld [vmem:[#allocation10 + $0x150] sm:$0xff]  ;;  %v473_v51 = vld [vmem:[#allocation10 + $0x178] sm:$0xff]  ;;  %v2017_v59 = vsub.s32 0, %v2014_v58  ;;  %v2023_v61 = vsub.s32 1, %v2014_v58 }
  0xb7   :  { %v1292_v5 = vpack.c.bf16 %v441_v3, %v439_v2  ;;  %v1322_v52 = vpack.c.bf16 %v468_v49, %v466_v48  ;;  %v1324_v53 = vpack.c.bf16 %v473_v51, %v471_v50  ;;  %v470_v54 = vld [vmem:[#allocation10 + $0x160] sm:$0xff]  ;;  %v472_v55 = vld [vmem:[#allocation10 + $0x170] sm:$0xff]  ;;  %v483_v25 = vld [vmem:[#allocation10 + $0x1c8] sm:$0xff] }
  0xb8   :  { %1291 = vmatpush1.bf16.msra.mxu0 %v1290_v4  ;;  %v1326_v56 = vpack.c.bf16 %v472_v55, %v470_v54  ;;  %v169_v60 = vld [vmem:[%s2081_s3] sm:$0x3]  ;;  %v487_v31 = vld [vmem:[#allocation10 + $0x1e8] sm:$0xff]  ;;  %v596_v42 = vld [vmem:[#allocation11 + $0x38] sm:$0xff] }
  0xb9   :  { %1251 = vmatpush1.bf16.msra.mxu1 %v1250_v7  ;;  %v440_v7 = vld [vmem:[#allocation10 + $0x70] sm:$0xff]  ;;  %1293 = vmatprep.subr.bf16.mxu0 %v1292_v5  ;;  %v174_v62 = vrot.slane %v169_v60, %v2017_v59  ;;  %v178_v63 = vrot.slane %v169_v60, %v2023_v61  ;;  %v590_v37 = vld [vmem:[#allocation11 + $0x8] sm:$0xff]  ;;  %v333_v55 = vld [vmem:[%s2083_s5] sm:$0x3] }
  0xba   :  { %1253 = vmatprep.subr.bf16.mxu1 %v1252_v8  ;;  %v443_v8 = vld [vmem:[#allocation10 + $0x88] sm:$0xff]  ;;  %v1294_v10 = vpack.c.bf16 %v440_v7, %v438_v6  ;;  %v599_v43 = vld [vmem:[#allocation11 + $0x50] sm:$0xff]  ;;  %v342_v57 = vrot.slane %v333_v55, %v2023_v61 }
  0xbb   :  { %v1296_v11 = vpack.c.bf16 %v445_v9, %v443_v8  ;;  %v595_v48 = vld [vmem:[#allocation11 + $0x30] sm:$0xff]  ;;  %v598_v50 = vld [vmem:[#allocation11 + $0x48] sm:$0xff] }
  0xbc   :  { %1295 = vmatpush1.bf16.msra.mxu0 %v1294_v10  ;;  %v602_v51 = vld [vmem:[#allocation11 + $0x68] sm:$0xff] }
  0xbd   :  { %1255 = vmatpush1.bf16.msra.mxu1 %v1254_v13  ;;  %v444_v13 = vld [vmem:[#allocation10 + $0x90] sm:$0xff]  ;;  %1297 = vmatprep.subr.bf16.mxu0 %v1296_v11 }
  0xbe   :  { %1257 = vmatprep.subr.bf16.mxu1 %v1256_v14  ;;  %v447_v14 = vld [vmem:[#allocation10 + $0xa8] sm:$0xff]  ;;  %v1298_v16 = vpack.c.bf16 %v444_v13, %v442_v12 }
  0xbf   :  { %v1300_v17 = vpack.c.bf16 %v449_v15, %v447_v14  ;;  %v475_v13 = vld [vmem:[#allocation10 + $0x188] sm:$0xff]  ;;  %v477_v14 = vld [vmem:[#allocation10 + $0x198] sm:$0xff] }
  0xc0   :  { %1299 = vmatpush1.bf16.msra.mxu0 %v1298_v16  ;;  %v1328_v15 = vpack.c.bf16 %v477_v14, %v475_v13  ;;  %v474_v16 = vld [vmem:[#allocation10 + $0x180] sm:$0xff]  ;;  %v604_v14 = vld [vmem:[#allocation11 + $0x78] sm:$0xff] }
  0xc1   :  { %1259 = vmatpush1.bf16.msra.mxu1 %v1258_v19  ;;  %v448_v19 = vld [vmem:[#allocation10 + $0xb0] sm:$0xff]  ;;  %1301 = vmatprep.subr.bf16.mxu0 %v1300_v17  ;;  %v601_v13 = vld [vmem:[#allocation11 + $0x60] sm:$0xff] }
  0xc2   :  { %1261 = vmatprep.subr.bf16.mxu1 %v1260_v20  ;;  %v451_v20 = vld [vmem:[#allocation10 + $0xc8] sm:$0xff]  ;;  %v1302_v22 = vpack.c.bf16 %v448_v19, %v446_v18  ;;  %v476_v17 = vld [vmem:[#allocation10 + $0x190] sm:$0xff] }
  0xc3   :  { %v1330_v18 = vpack.c.bf16 %v476_v17, %v474_v16  ;;  %v479_v19 = vld [vmem:[#allocation10 + $0x1a8] sm:$0xff]  ;;  %v608_v16 = vld [vmem:[#allocation11 + $0x98] sm:$0xff]  ;;  %v611_v17 = vld [vmem:[#allocation11 + $0xb0] sm:$0xff] }
  0xc4   :  { %1303 = vmatpush1.bf16.msra.mxu0 %v1302_v22  ;;  %v478_v22 = vld [vmem:[#allocation10 + $0x1a0] sm:$0xff] }
  0xc5   :  { %1263 = vmatpush1.bf16.msra.mxu1 %v1262_v23  ;;  %v1304_v23 = vpack.c.bf16 %v453_v21, %v451_v20  ;;  %v481_v20 = vld [vmem:[#allocation10 + $0x1b8] sm:$0xff] }
  0xc6   :  { %1265 = vmatprep.subr.bf16.mxu1 %v1264_v26  ;;  %v455_v26 = vld [vmem:[#allocation10 + $0xe8] sm:$0xff]  ;;  %v1332_v21 = vpack.c.bf16 %v481_v20, %v479_v19  ;;  %v1356_v19 = vpack.c.bf16 %v611_v17, %v608_v16 }
  0xc7   :  { %1305 = vmatprep.subr.bf16.mxu0 %v1304_v23  ;;  %v480_v23 = vld [vmem:[#allocation10 + $0x1b0] sm:$0xff]  ;;  %v606_v20 = vld [vmem:[#allocation11 + $0x88] sm:$0xff] }
  0xc8   :  { %1307 = vmatpush1.bf16.msra.mxu0 %v1306_v28  ;;  %v1334_v24 = vpack.c.bf16 %v480_v23, %v478_v22  ;;  %v482_v28 = vld [vmem:[#allocation10 + $0x1c0] sm:$0xff]  ;;  %v610_v22 = vld [vmem:[#allocation11 + $0xa8] sm:$0xff] }
  0xc9   :  { %1267 = vmatpush1.bf16.msra.mxu1 %v1266_v29  ;;  %v1308_v29 = vpack.c.bf16 %v457_v27, %v455_v26  ;;  %v485_v26 = vld [vmem:[#allocation10 + $0x1d8] sm:$0xff] }
  0xca   :  { %1269 = vmatprep.subr.bf16.mxu1 %v1268_v32  ;;  %v459_v32 = vld [vmem:[#allocation10 + $0x108] sm:$0xff]  ;;  %v1336_v27 = vpack.c.bf16 %v485_v26, %v483_v25  ;;  %v617_v26 = vld [vmem:[#allocation11 + $0xe0] sm:$0xff] }
  0xcb   :  { %1309 = vmatprep.subr.bf16.mxu0 %v1308_v29  ;;  %v484_v29 = vld [vmem:[#allocation10 + $0x1d0] sm:$0xff]  ;;  %v614_v25 = vld [vmem:[#allocation11 + $0xc8] sm:$0xff] }
  0xcc   :  { %1311 = vmatpush1.bf16.msra.mxu0 %v1310_v34  ;;  %v1338_v30 = vpack.c.bf16 %v484_v29, %v482_v28  ;;  %v1360_v28 = vpack.c.bf16 %v617_v26, %v614_v25  ;;  %v612_v29 = vld [vmem:[#allocation11 + $0xb8] sm:$0xff]  ;;  %v815_v26 = vld [vmem:[#allocation13 + $0x28] sm:$0xff] }
  0xcd   :  { %1271 = vmatpush1.bf16.msra.mxu1 %v1270_v35  ;;  %v1312_v35 = vpack.c.bf16 %v461_v33, %v459_v32  ;;  %v489_v32 = vld [vmem:[#allocation10 + $0x1f8] sm:$0xff]  ;;  %v486_v33 = vld [vmem:[#allocation10 + $0x1e0] sm:$0xff] }
  0xce   :  { %1273 = vmatprep.subr.bf16.mxu1 %v1272_v38  ;;  %v463_v38 = vld [vmem:[#allocation10 + $0x128] sm:$0xff]  ;;  %v1340_v34 = vpack.c.bf16 %v489_v32, %v487_v31  ;;  %v616_v31 = vld [vmem:[#allocation11 + $0xd8] sm:$0xff] }
  0xcf   :  { %1313 = vmatprep.subr.bf16.mxu0 %v1312_v35  ;;  %v488_v35 = vld [vmem:[#allocation10 + $0x1f0] sm:$0xff] }
  0xd0   :  { %1315 = vmatpush1.bf16.msra.mxu0 %v1314_v40  ;;  %v1342_v36 = vpack.c.bf16 %v488_v35, %v486_v33  ;;  %v623_v35 = vld [vmem:[#allocation11 + $0x110] sm:$0xff] }
  0xd1   :  { %1275 = vmatpush1.bf16.msra.mxu1 %v1274_v41  ;;  %v1316_v41 = vpack.c.bf16 %v465_v39, %v463_v38  ;;  %v593_v38 = vld [vmem:[#allocation11 + $0x20] sm:$0xff] }
  0xd2   :  { %1277 = vmatprep.subr.bf16.mxu1 %v1276_v45  ;;  %v469_v45 = vld [vmem:[#allocation10 + $0x158] sm:$0xff]  ;;  %v589_v39 = vld [vmem:[#allocation11] sm:$0xff]  ;;  %v1344_v40 = vpack.c.bf16 %v593_v38, %v590_v37  ;;  %v618_v38 = vld [vmem:[#allocation11 + $0xe8] sm:$0xff] }
  0xd3   :  { %1317 = vmatprep.subr.bf16.mxu0 %v1316_v41  ;;  %v592_v41 = vld [vmem:[#allocation11 + $0x18] sm:$0xff] }
  0xd4   :  { %1319 = vmatpush1.bf16.msra.mxu0 %v1318_v46  ;;  %v591_v46 = vld [vmem:[#allocation11 + $0x10] sm:$0xff] }
  0xd5   :  { %1279 = vmatpush1.bf16.msra.mxu1 %v1278_v47  ;;  %v1320_v47 = vpack.c.bf16 %v469_v45, %v467_v44  ;;  %v1346_v44 = vpack.c.bf16 %v592_v41, %v589_v39  ;;  %v1348_v45 = vpack.c.bf16 %v599_v43, %v596_v42  ;;  %v619_v39 = vld [vmem:[#allocation11 + $0xf0] sm:$0xff]  ;;  %v626_v43 = vld [vmem:[#allocation11 + $0x128] sm:$0xff] }
  0xd6   :  { %1345 = vmatprep.subr.bf16.mxu1 %v1344_v40  ;;  %v622_v40 = vld [vmem:[#allocation11 + $0x108] sm:$0xff] }
  0xd7   :  { %1321 = vmatprep.subr.bf16.mxu0 %v1320_v47  ;;  %v594_v47 = vld [vmem:[#allocation11 + $0x28] sm:$0xff]  ;;  %v1366_v42 = vpack.c.bf16 %v622_v40, %v619_v39 }
  0xd8   :  { %1323 = vmatpush1.bf16.msra.mxu0 %v1322_v52  ;;  %v1376_v49 = vpack.c.bf16 %v594_v47, %v591_v46  ;;  %v605_v52 = vld [vmem:[#allocation11 + $0x80] sm:$0xff]  ;;  %v624_v47 = vld [vmem:[#allocation11 + $0x118] sm:$0xff] }
  0xd9   :  { %1325 = vmatprep.subr.bf16.mxu0 %v1324_v53  ;;  %v1350_v53 = vpack.c.bf16 %v598_v50, %v595_v48  ;;  %v1352_v54 = vpack.c.bf16 %v605_v52, %v602_v51  ;;  %v625_v48 = vld [vmem:[#allocation11 + $0x120] sm:$0xff]  ;;  %v632_v52 = vld [vmem:[#allocation11 + $0x158] sm:$0xff] }
  0xdc   :  { %1327 = vmatpush1.bf16.msra.mxu0 %v1326_v56  ;;  %v338_v56 = vrot.slane %v333_v55, %v2017_v59 }
  0xdd   :  { %1329 = vmatprep.subr.bf16.mxu0 %v1328_v15  ;;  %v1354_v15 = vpack.c.bf16 %v604_v14, %v601_v13 }
  0xe0   :  { %1331 = vmatpush1.bf16.msra.mxu0 %v1330_v18  ;;  %v603_v18 = vld [vmem:[#allocation11 + $0x70] sm:$0xff] }
  0xe1   :  { %1333 = vmatprep.subr.bf16.mxu0 %v1332_v21  ;;  %v607_v21 = vld [vmem:[#allocation11 + $0x90] sm:$0xff]  ;;  %v1384_v23 = vpack.c.bf16 %v606_v20, %v603_v18 }
  0xe4   :  { %1335 = vmatpush1.bf16.msra.mxu0 %v1334_v24  ;;  %v1358_v24 = vpack.c.bf16 %v610_v22, %v607_v21  ;;  %v159_v22 = vld [vmem:[#allocation5] sm:$0xff] }
  0xe5   :  { %1337 = vmatprep.subr.bf16.mxu0 %v1336_v27  ;;  %v609_v27 = vld [vmem:[#allocation11 + $0xa0] sm:$0xff] }
  0xe6   :  { %v1388_v32 = vpack.c.bf16 %v612_v29, %v609_v27  ;;  %v817_v27 = vld [vmem:[#allocation13 + $0x38] sm:$0xff] }
  0xe7   :  { %v160_v29 = vld [vmem:[#allocation5 + $0x8] sm:$0xff] }
  0xe8   :  { %1339 = vmatpush1.bf16.msra.mxu0 %v1338_v30  ;;  %v613_v30 = vld [vmem:[#allocation11 + $0xc0] sm:$0xff] }
  0xe9   :  { %1341 = vmatprep.subr.bf16.mxu0 %v1340_v34  ;;  %v1362_v33 = vpack.c.bf16 %v616_v31, %v613_v30  ;;  %v620_v34 = vld [vmem:[#allocation11 + $0xf8] sm:$0xff] }
  0xea   :  { %v1364_v37 = vpack.c.bf16 %v623_v35, %v620_v34  ;;  %v816_v34 = vld [vmem:[#allocation13 + $0x30] sm:$0xff] }
  0xec   :  { %1343 = vmatpush1.bf16.msra.mxu0 %v1342_v36  ;;  %v615_v36 = vld [vmem:[#allocation11 + $0xd0] sm:$0xff] }
  0xed   :  { %1377 = vmatprep.subr.bf16.mxu0 %v1376_v49  ;;  %v1392_v41 = vpack.c.bf16 %v618_v38, %v615_v36  ;;  %v819_v36 = vld [vmem:[#allocation13 + $0x48] sm:$0xff] }
 0x170   :  { %v254_v1 = vpop.f32.mrb[0].mxu0 }
 0x171   :  { %v255_v2 = vadd.f32 %v254_v1, %v174_v62  ;;  %v256_v3 = vpop.f32.mrb[1].mxu0 }
 0x172   :  { %v257_v4 = vadd.f32 %v256_v3, %v178_v63 }
 0x174   :  { %1554 = vtanh.f32 %v257_v4  ;;  %v260_v5 = vpop.f32.mrb[2].mxu0 }
 0x175   :  { %1556 = vtanh.f32 %v255_v2  ;;  %v261_v6 = vadd.f32 %v260_v5, %v174_v62  ;;  %v262_v7 = vpop.f32.mrb[3].mxu0 }
 0x176   :  { %v263_v8 = vadd.f32 %v262_v7, %v178_v63  ;;  %v600_v7 = vld [vmem:[#allocation11 + $0x58] sm:$0xff] }
 0x178   :  { %1558 = vtanh.f32 %v263_v8 }
 0x179   :  { %1560 = vtanh.f32 %v261_v6  ;;  %v597_v6 = vld [vmem:[#allocation11 + $0x40] sm:$0xff] }
 0x17e   :  { %v1555_v9 = vpop.eup %1554 }
 0x17f   :  { %v1557_v10 = vpop.eup %1556  ;;  %409 = vmatprep.mubr.f32.mxu1 %v1555_v9  ;;  %v1380_v9 = vpack.c.bf16 %v600_v7, %v597_v6  ;;  %v490_v7 = vld [vmem:[%s2085_s7] sm:$0x3] }
 0x180   :  { %410 = vmatmul.mubr.f32.vlgmr.msra.gmra.mrb[0].mxu1 %v1557_v10 }
 0x181   :  { %1347 = vmatpush1.bf16.msra.mxu1 %v1346_v44  ;;  %v629_v44 = vld [vmem:[#allocation11 + $0x140] sm:$0xff] }
 0x182   :  { %v1559_v11 = vpop.eup %1558  ;;  %1349 = vmatprep.subr.bf16.mxu1 %v1348_v45  ;;  %v621_v45 = vld [vmem:[#allocation11 + $0x100] sm:$0xff]  ;;  %v1368_v46 = vpack.c.bf16 %v629_v44, %v626_v43  ;;  %v820_v43 = vld [vmem:[#allocation13 + $0x50] sm:$0xff]  ;;  %v823_v44 = vld [vmem:[#allocation13 + $0x68] sm:$0xff] }
 0x183   :  { %v1561_v12 = vpop.eup %1560  ;;  %415 = vmatprep.mubr.f32.mxu1 %v1559_v11  ;;  %v1396_v50 = vpack.c.bf16 %v624_v47, %v621_v45  ;;  %v825_v45 = vld [vmem:[#allocation13 + $0x78] sm:$0xff] }
 0x184   :  { %416 = vmatmul.mubr.f32.gmra.mrb[2].mxu1 %v1561_v12  ;;  %v1420_v47 = vpack.c.bf16 %v825_v45, %v823_v44  ;;  %v863_v44 = vld [vmem:[#allocation13 + $0x1a8] sm:$0xff]  ;;  %v865_v45 = vld [vmem:[#allocation13 + $0x1b8] sm:$0xff] }
 0x185   :  { %718 = vmatprep.mubr.f32.mxu1 %v1814_v0  ;;  %1351 = vmatpush1.bf16.msra.mxu1 %v1350_v53  ;;  %v635_v53 = vld [vmem:[#allocation11 + $0x170] sm:$0xff] }
 0x186   :  { %1353 = vmatprep.subr.bf16.mxu1 %v1352_v54  ;;  %v627_v54 = vld [vmem:[#allocation11 + $0x130] sm:$0xff]  ;;  %v1372_v55 = vpack.c.bf16 %v635_v53, %v632_v52  ;;  %v826_v53 = vld [vmem:[#allocation13 + $0x80] sm:$0xff] }
 0x189   :  { %1355 = vmatpush1.bf16.msra.mxu1 %v1354_v15 }
 0x18a   :  { %1357 = vmatprep.subr.bf16.mxu1 %v1356_v19 }
 0x18d   :  { %1359 = vmatpush1.bf16.msra.mxu1 %v1358_v24  ;;  %v812_v24 = vld [vmem:[#allocation13 + $0x10] sm:$0xff] }
 0x18e   :  { %1361 = vmatprep.subr.bf16.mxu1 %v1360_v28 }
 0x191   :  { %1363 = vmatpush1.bf16.msra.mxu1 %v1362_v33  ;;  %v814_v33 = vld [vmem:[#allocation13 + $0x20] sm:$0xff] }
 0x192   :  { %1365 = vmatprep.subr.bf16.mxu1 %v1364_v37  ;;  %v821_v37 = vld [vmem:[#allocation13 + $0x58] sm:$0xff]  ;;  %v1414_v39 = vpack.c.bf16 %v816_v34, %v814_v33 }
 0x195   :  { %1367 = vmatpush1.bf16.msra.mxu1 %v1366_v42  ;;  %v818_v42 = vld [vmem:[#allocation13 + $0x40] sm:$0xff] }
 0x196   :  { %1369 = vmatprep.subr.bf16.mxu1 %v1368_v46  ;;  %v1418_v46 = vpack.c.bf16 %v820_v43, %v818_v42  ;;  %v860_v42 = vld [vmem:[#allocation13 + $0x190] sm:$0xff] }
 0x253   :  { %v411_v60 = vpop.f32.mrb[0].mxu1 }
 0x254   :  { %v412_v62 = vadd.f32 %v411_v60, %v338_v56  ;;  %v413_v63 = vpop.f32.mrb[1].mxu1  ;;  %v634_v60 = vld [vmem:[#allocation11 + $0x168] sm:$0xff] }
 0x255   :  { %v414_v1 = vadd.f32 %v413_v63, %v342_v57 }
 0x257   :  { %1562 = vtanh.f32 %v414_v1  ;;  %v417_v2 = vpop.f32.mrb[2].mxu1  ;;  %v633_v1 = vld [vmem:[#allocation11 + $0x160] sm:$0xff] }
 0x258   :  { %1564 = vtanh.f32 %v412_v62  ;;  %v418_v3 = vadd.f32 %v417_v2, %v338_v56  ;;  %v419_v4 = vpop.f32.mrb[3].mxu1  ;;  %v630_v56 = vld [vmem:[#allocation11 + $0x148] sm:$0xff]  ;;  %v636_v2 = vld [vmem:[#allocation11 + $0x178] sm:$0xff] }
 0x259   :  { %v420_v5 = vadd.f32 %v419_v4, %v342_v57  ;;  %v631_v57 = vld [vmem:[#allocation11 + $0x150] sm:$0xff]  ;;  %v1400_v62 = vpack.c.bf16 %v630_v56, %v627_v54  ;;  %v811_v4 = vld [vmem:[#allocation13 + $0x8] sm:$0xff]  ;;  %v833_v56 = vld [vmem:[#allocation13 + $0xb8] sm:$0xff] }
 0x25a   :  { %v1374_v63 = vpack.c.bf16 %v634_v60, %v631_v57  ;;  %v828_v54 = vld [vmem:[#allocation13 + $0x90] sm:$0xff] }
 0x25b   :  { %1566 = vtanh.f32 %v420_v5  ;;  %v813_v5 = vld [vmem:[#allocation13 + $0x18] sm:$0xff]  ;;  %v1426_v57 = vpack.c.bf16 %v828_v54, %v826_v53  ;;  %v868_v53 = vld [vmem:[#allocation13 + $0x1d0] sm:$0xff] }
 0x25c   :  { %1568 = vtanh.f32 %v418_v3  ;;  %v1404_v3 = vpack.c.bf16 %v636_v2, %v633_v1  ;;  %v1408_v6 = vpack.c.bf16 %v813_v5, %v811_v4  ;;  %v835_v1 = vld [vmem:[#allocation13 + $0xc8] sm:$0xff]  ;;  %v837_v2 = vld [vmem:[#allocation13 + $0xd8] sm:$0xff]  ;;  %v834_v5 = vld [vmem:[#allocation13 + $0xc0] sm:$0xff] }
 0x25d   :  { %v1432_v4 = vpack.c.bf16 %v837_v2, %v835_v1  ;;  %v968_v1 = vld [vmem:[#allocation14 + $0x8] sm:$0xff]  ;;  %v970_v2 = vld [vmem:[#allocation14 + $0x18] sm:$0xff] }
 0x261   :  { %v1563_v8 = vpop.eup %1562 }
 0x262   :  { %v1565_v10 = vpop.eup %1564  ;;  %566 = vmatprep.mubr.f32.mxu0 %v1563_v8  ;;  %v495_v8 = vrot.slane %v490_v7, %v2017_v59 }
 0x263   :  { %567 = vmatmul.mubr.f32.vlgmr.msra.gmra.mrb[4].mxu0 %v1565_v10 }
 0x264   :  { %1379 = vmatpush3.bf16.msra.mxu0 %v1376_v49  ;;  %v628_v49 = vld [vmem:[#allocation11 + $0x138] sm:$0xff] }
 0x265   :  { %v1567_v11 = vpop.eup %1566  ;;  %1381 = vmatprep.subr.bf16.mxu0 %v1380_v9  ;;  %v1370_v51 = vpack.c.bf16 %v628_v49, %v625_v48  ;;  %v822_v48 = vld [vmem:[#allocation13 + $0x60] sm:$0xff]  ;;  %v824_v49 = vld [vmem:[#allocation13 + $0x70] sm:$0xff] }
 0x266   :  { %v1569_v12 = vpop.eup %1568  ;;  %572 = vmatprep.mubr.f32.mxu0 %v1567_v11 }
 0x267   :  { %573 = vmatmul.mubr.f32.gmra.mrb[6].mxu0 %v1569_v12  ;;  %1371 = vmatpush1.bf16.msra.mxu1 %v1370_v51  ;;  %v1422_v51 = vpack.c.bf16 %v824_v49, %v822_v48  ;;  %v864_v48 = vld [vmem:[#allocation13 + $0x1b0] sm:$0xff] }
 0x268   :  { %1383 = vmatpush3.bf16.msra.mxu0 %v1380_v9  ;;  %1373 = vmatprep.subr.bf16.mxu1 %v1372_v55  ;;  %v499_v9 = vrot.slane %v490_v7, %v2023_v61  ;;  %v831_v55 = vld [vmem:[#allocation13 + $0xa8] sm:$0xff] }
 0x269   :  { %1385 = vmatprep.subr.bf16.mxu0 %v1384_v23  ;;  %v1428_v60 = vpack.c.bf16 %v833_v56, %v831_v55  ;;  %v839_v7 = vld [vmem:[#allocation13 + $0xe8] sm:$0xff]  ;;  %v873_v56 = vld [vmem:[#allocation13 + $0x1f8] sm:$0xff] }
 0x26a   :  { %v871_v55 = vld [vmem:[#allocation13 + $0x1e8] sm:$0xff] }
 0x26b   :  { %1375 = vmatpush1.bf16.msra.mxu1 %v1374_v63  ;;  %v832_v63 = vld [vmem:[#allocation13 + $0xb0] sm:$0xff] }
 0x26c   :  { %1387 = vmatpush3.bf16.msra.mxu0 %v1384_v23  ;;  %1409 = vmatprep.subr.bf16.mxu1 %v1408_v6  ;;  %v810_v23 = vld [vmem:[#allocation13] sm:$0xff]  ;;  %v836_v6 = vld [vmem:[#allocation13 + $0xd0] sm:$0xff] }
 0x26d   :  { %1389 = vmatprep.subr.bf16.mxu0 %v1388_v32  ;;  %v1410_v30 = vpack.c.bf16 %v812_v24, %v810_v23  ;;  %v846_v23 = vld [vmem:[#allocation13 + $0x120] sm:$0xff]  ;;  %v848_v24 = vld [vmem:[#allocation13 + $0x130] sm:$0xff] }
 0x270   :  { %1391 = vmatpush3.bf16.msra.mxu0 %v1388_v32  ;;  %v1412_v32 = vpack.c.bf16 %v817_v27, %v815_v26  ;;  %v853_v26 = vld [vmem:[#allocation13 + $0x158] sm:$0xff]  ;;  %v1446_v27 = vpack.c.bf16 %v848_v24, %v846_v23  ;;  %v981_v23 = vld [vmem:[#allocation14 + $0x70] sm:$0xff]  ;;  %v984_v24 = vld [vmem:[#allocation14 + $0x88] sm:$0xff] }
 0x271   :  { %1393 = vmatprep.subr.bf16.mxu0 %v1392_v41 }
 0x274   :  { %1395 = vmatpush3.bf16.msra.mxu0 %v1392_v41  ;;  %v1416_v41 = vpack.c.bf16 %v821_v37, %v819_v36  ;;  %v856_v36 = vld [vmem:[#allocation13 + $0x170] sm:$0xff] }
 0x275   :  { %1397 = vmatprep.subr.bf16.mxu0 %v1396_v50 }
 0x278   :  { %1399 = vmatpush3.bf16.msra.mxu0 %v1396_v50  ;;  %v827_v50 = vld [vmem:[#allocation13 + $0x88] sm:$0xff] }
 0x279   :  { %1401 = vmatprep.subr.bf16.mxu0 %v1400_v62 }
 0x27c   :  { %1403 = vmatpush3.bf16.msra.mxu0 %v1400_v62  ;;  %v830_v62 = vld [vmem:[#allocation13 + $0xa0] sm:$0xff] }
 0x27d   :  { %1405 = vmatprep.subr.bf16.mxu0 %v1404_v3 }
 0x280   :  { %1407 = vmatpush3.bf16.msra.mxu0 %v1404_v3  ;;  %v1430_v3 = vpack.c.bf16 %v832_v63, %v830_v62  ;;  %v872_v62 = vld [vmem:[#allocation13 + $0x1f0] sm:$0xff] }
 0x336   :  { %v568_v10 = vpop.f32.mrb[4].mxu0 }
 0x337   :  { %v569_v11 = vadd.f32 %v568_v10, %v495_v8  ;;  %v570_v12 = vpop.f32.mrb[5].mxu0 }
 0x338   :  { %v571_v13 = vadd.f32 %v570_v12, %v499_v9  ;;  %v840_v12 = vld [vmem:[#allocation13 + $0xf0] sm:$0xff] }
 0x339   :  { %1125 = vst [vmem:[#allocation16 + $0x18] sm:$0xff] %v569_v11 }
 0x33a   :  { %v579_v14 = vmul.f32 0.5, %v571_v13  ;;  %1126 = vst [vmem:[#allocation16 + $0x20] sm:$0xff] %v571_v13  ;;  %v574_v15 = vpop.f32.mrb[6].mxu0  ;;  %v843_v13 = vld [vmem:[#allocation13 + $0x108] sm:$0xff] }
 0x33b   :  { %v575_v16 = vadd.f32 %v574_v15, %v495_v8  ;;  %v576_v17 = vpop.f32.mrb[7].mxu0  ;;  %v841_v8 = vld [vmem:[#allocation13 + $0xf8] sm:$0xff] }
 0x33c   :  { %v581_v18 = vmul.f32 1.442695, %v579_v14  ;;  %v577_v19 = vadd.f32 %v576_v17, %v499_v9  ;;  %v1434_v9 = vpack.c.bf16 %v836_v6, %v834_v5  ;;  %v1436_v10 = vpack.c.bf16 %v841_v8, %v839_v7  ;;  %v845_v14 = vld [vmem:[#allocation13 + $0x118] sm:$0xff]  ;;  %v842_v17 = vld [vmem:[#allocation13 + $0x100] sm:$0xff]  ;;  %v969_v5 = vld [vmem:[#allocation14 + $0x10] sm:$0xff] }
 0x33d   :  { %1130 = vst [vmem:[#allocation16 + $0x40] sm:$0xff] %v575_v16  ;;  %v972_v6 = vld [vmem:[#allocation14 + $0x28] sm:$0xff]  ;;  %v974_v7 = vld [vmem:[#allocation14 + $0x38] sm:$0xff] }
 0x33e   :  { %1570 = vpow2.f32 %v581_v18  ;;  %v580_v20 = vmul.f32 0.5, %v577_v19  ;;  %1131 = vst [vmem:[#allocation16 + $0x48] sm:$0xff] %v577_v19  ;;  %v844_v18 = vld [vmem:[#allocation13 + $0x110] sm:$0xff]  ;;  %v847_v19 = vld [vmem:[#allocation13 + $0x128] sm:$0xff] }
 0x340   :  { %v583_v21 = vmul.f32 1.442695, %v580_v20  ;;  %v849_v20 = vld [vmem:[#allocation13 + $0x138] sm:$0xff] }
 0x342   :  { %1572 = vpow2.f32 %v583_v21  ;;  %v1442_v21 = vpack.c.bf16 %v844_v18, %v842_v17  ;;  %v977_v17 = vld [vmem:[#allocation14 + $0x50] sm:$0xff]  ;;  %v980_v18 = vld [vmem:[#allocation14 + $0x68] sm:$0xff] }
 0x348   :  { %v1571_v25 = vpop.eup %1570 }
 0x349   :  { %v585_v28 = vmul.f32 %v1571_v25, %v159_v22  ;;  %v1444_v22 = vpack.c.bf16 %v849_v20, %v847_v19  ;;  %v851_v25 = vld [vmem:[#allocation13 + $0x148] sm:$0xff]  ;;  %v982_v19 = vld [vmem:[#allocation14 + $0x78] sm:$0xff] }
 0x34b   :  { %v587_v31 = vadd.f32 %v585_v28, %v569_v11  ;;  %v838_v11 = vld [vmem:[#allocation13 + $0xe0] sm:$0xff]  ;;  %v1448_v28 = vpack.c.bf16 %v853_v26, %v851_v25  ;;  %v986_v25 = vld [vmem:[#allocation14 + $0x98] sm:$0xff] }
 0x34c   :  { %v1573_v35 = vpop.eup %1572  ;;  %v1438_v15 = vpack.c.bf16 %v840_v12, %v838_v11  ;;  %v973_v11 = vld [vmem:[#allocation14 + $0x30] sm:$0xff]  ;;  %v976_v12 = vld [vmem:[#allocation14 + $0x48] sm:$0xff] }
 0x34d   :  { %719 = vmatmul.mubr.f32.vlgmr.msra.gmra.mrb[4].mxu1 %v587_v31  ;;  %1124 = vst [vmem:[#allocation16 + $0x10] sm:$0xff] %v587_v31  ;;  %1205 = vmatprep.mubr.f32.mxu0 %v587_v31  ;;  %v586_v38 = vmul.f32 %v1573_v35, %v160_v29  ;;  %v850_v29 = vld [vmem:[#allocation13 + $0x140] sm:$0xff]  ;;  %v855_v31 = vld [vmem:[#allocation13 + $0x168] sm:$0xff] }
 0x34e   :  { %724 = vmatprep.mubr.f32.mxu1 %v1814_v0  ;;  %1411 = vmatpush1.bf16.msra.mxu1 %v1410_v30  ;;  %v829_v0 = vld [vmem:[#allocation13 + $0x98] sm:$0xff]  ;;  %v852_v30 = vld [vmem:[#allocation13 + $0x150] sm:$0xff]  ;;  %v854_v35 = vld [vmem:[#allocation13 + $0x160] sm:$0xff] }
 0x34f   :  { %v588_v40 = vadd.f32 %v586_v38, %v575_v16  ;;  %1413 = vmatprep.subr.bf16.mxu1 %v1412_v32  ;;  %v1424_v52 = vpack.c.bf16 %v829_v0, %v827_v50  ;;  %v1440_v16 = vpack.c.bf16 %v845_v14, %v843_v13  ;;  %v857_v32 = vld [vmem:[#allocation13 + $0x178] sm:$0xff]  ;;  %v1450_v33 = vpack.c.bf16 %v852_v30, %v850_v29  ;;  %v859_v38 = vld [vmem:[#allocation13 + $0x188] sm:$0xff]  ;;  %v985_v29 = vld [vmem:[#allocation14 + $0x90] sm:$0xff] }
 0x350   :  { %v1452_v34 = vpack.c.bf16 %v857_v32, %v855_v31  ;;  %v1454_v37 = vpack.c.bf16 %v856_v36, %v854_v35  ;;  %v867_v50 = vld [vmem:[#allocation13 + $0x1c8] sm:$0xff]  ;;  %v869_v0 = vld [vmem:[#allocation13 + $0x1d8] sm:$0xff]  ;;  %v989_v35 = vld [vmem:[#allocation14 + $0xb0] sm:$0xff] }
 0x351   :  { %725 = vmatmul.mubr.f32.gmra.mrb[6].mxu1 %v588_v40  ;;  %1129 = vst [vmem:[#allocation16 + $0x38] sm:$0xff] %v588_v40  ;;  %1206 = vmatmul.mubr.f32.vlgmr.msra.gmra.mrb[8].mxu0 %v588_v40  ;;  %v978_v13 = vld [vmem:[#allocation14 + $0x58] sm:$0xff]  ;;  %v988_v30 = vld [vmem:[#allocation14 + $0xa8] sm:$0xff] }
 0x352   :  { %1415 = vmatpush1.bf16.msra.mxu1 %v1414_v39  ;;  %v861_v39 = vld [vmem:[#allocation13 + $0x198] sm:$0xff]  ;;  %v992_v36 = vld [vmem:[#allocation14 + $0xc8] sm:$0xff] }
 0x353   :  { %1417 = vmatprep.subr.bf16.mxu1 %v1416_v41  ;;  %v1456_v40 = vpack.c.bf16 %v861_v39, %v859_v38  ;;  %v858_v41 = vld [vmem:[#allocation13 + $0x180] sm:$0xff]  ;;  %v990_v31 = vld [vmem:[#allocation14 + $0xb8] sm:$0xff] }
 0x354   :  { %v1458_v43 = vpack.c.bf16 %v860_v42, %v858_v41  ;;  %v993_v41 = vld [vmem:[#allocation14 + $0xd0] sm:$0xff]  ;;  %v996_v42 = vld [vmem:[#allocation14 + $0xe8] sm:$0xff] }
 0x356   :  { %1419 = vmatpush1.bf16.msra.mxu1 %v1418_v46  ;;  %v1460_v46 = vpack.c.bf16 %v865_v45, %v863_v44 }
 0x357   :  { %1421 = vmatprep.subr.bf16.mxu1 %v1420_v47  ;;  %v862_v47 = vld [vmem:[#allocation13 + $0x1a0] sm:$0xff] }
 0x358   :  { %v1462_v49 = vpack.c.bf16 %v864_v48, %v862_v47  ;;  %v997_v47 = vld [vmem:[#allocation14 + $0xf0] sm:$0xff]  ;;  %v1000_v48 = vld [vmem:[#allocation14 + $0x108] sm:$0xff] }
 0x35a   :  { %1423 = vmatpush1.bf16.msra.mxu1 %v1422_v51  ;;  %v1464_v51 = vpack.c.bf16 %v869_v0, %v867_v50 }
 0x35b   :  { %1425 = vmatprep.subr.bf16.mxu1 %v1424_v52  ;;  %v866_v52 = vld [vmem:[#allocation13 + $0x1c0] sm:$0xff] }
 0x35c   :  { %v1466_v54 = vpack.c.bf16 %v868_v53, %v866_v52  ;;  %v1001_v52 = vld [vmem:[#allocation14 + $0x110] sm:$0xff]  ;;  %v1004_v53 = vld [vmem:[#allocation14 + $0x128] sm:$0xff] }
 0x35e   :  { %1427 = vmatpush1.bf16.msra.mxu1 %v1426_v57  ;;  %v870_v57 = vld [vmem:[#allocation13 + $0x1e0] sm:$0xff] }
 0x35f   :  { %1429 = vmatprep.subr.bf16.mxu1 %v1428_v60  ;;  %v1468_v60 = vpack.c.bf16 %v873_v56, %v871_v55  ;;  %v1470_v63 = vpack.c.bf16 %v872_v62, %v870_v57  ;;  %v1003_v57 = vld [vmem:[#allocation14 + $0x120] sm:$0xff]  ;;  %v1008_v62 = vld [vmem:[#allocation14 + $0x148] sm:$0xff] }
 0x362   :  { %1431 = vmatpush1.bf16.msra.mxu1 %v1430_v3  ;;  %v967_v3 = vld [vmem:[#allocation14] sm:$0xff] }
 0x363   :  { %1433 = vmatprep.subr.bf16.mxu1 %v1432_v4  ;;  %v1472_v4 = vpack.c.bf16 %v970_v2, %v968_v1  ;;  %v1474_v8 = vpack.c.bf16 %v969_v5, %v967_v3  ;;  %v1007_v3 = vld [vmem:[#allocation14 + $0x140] sm:$0xff]  ;;  %v1012_v5 = vld [vmem:[#allocation14 + $0x168] sm:$0xff] }
 0x365   :  { %1473 = vmatprep.subr.bf16.mxu0 %v1472_v4  ;;  %v1009_v4 = vld [vmem:[#allocation14 + $0x150] sm:$0xff] }
 0x366   :  { %1435 = vmatpush1.bf16.msra.mxu1 %v1434_v9  ;;  %v1476_v9 = vpack.c.bf16 %v974_v7, %v972_v6  ;;  %1475 = vmatpush1.bf16.msra.mxu0 %v1474_v8  ;;  %v1014_v6 = vld [vmem:[#allocation14 + $0x178] sm:$0xff]  ;;  %v1514_v7 = vpack.c.bf16 %v1009_v4, %v1007_v3 }
 0x367   :  { %1437 = vmatprep.subr.bf16.mxu1 %v1436_v10  ;;  %v971_v10 = vld [vmem:[#allocation14 + $0x20] sm:$0xff]  ;;  %v1516_v8 = vpack.c.bf16 %v1014_v6, %v1012_v5 }
 0x368   :  { %v1478_v14 = vpack.c.bf16 %v973_v11, %v971_v10  ;;  %1477 = vmatprep.subr.bf16.mxu0 %v1476_v9  ;;  %v1011_v9 = vld [vmem:[#allocation14 + $0x160] sm:$0xff]  ;;  %v1013_v10 = vld [vmem:[#allocation14 + $0x170] sm:$0xff] }
 0x369   :  { %v1518_v11 = vpack.c.bf16 %v1013_v10, %v1011_v9 }
 0x36a   :  { %1439 = vmatpush1.bf16.msra.mxu1 %v1438_v15  ;;  %v1480_v15 = vpack.c.bf16 %v978_v13, %v976_v12  ;;  %1479 = vmatpush1.bf16.msra.mxu0 %v1478_v14  ;;  %v2042_v12 = vld [vmem:[%s2087_s9] sm:$0x7] }
 0x36b   :  { %1441 = vmatprep.subr.bf16.mxu1 %v1440_v16  ;;  %v975_v16 = vld [vmem:[#allocation14 + $0x40] sm:$0xff]  ;;  %v642_v13 = vrot.slane %v2042_v12, %v2017_v59  ;;  %v646_v14 = vrot.slane %v2042_v12, %v2023_v61 }
 0x36c   :  { %v1482_v20 = vpack.c.bf16 %v977_v17, %v975_v16  ;;  %1481 = vmatprep.subr.bf16.mxu0 %v1480_v15 }
 0x36e   :  { %1443 = vmatpush1.bf16.msra.mxu1 %v1442_v21  ;;  %v1484_v21 = vpack.c.bf16 %v982_v19, %v980_v18  ;;  %1483 = vmatpush1.bf16.msra.mxu0 %v1482_v20 }
 0x36f   :  { %1445 = vmatprep.subr.bf16.mxu1 %v1444_v22  ;;  %v979_v22 = vld [vmem:[#allocation14 + $0x60] sm:$0xff] }
 0x370   :  { %v1486_v26 = vpack.c.bf16 %v981_v23, %v979_v22  ;;  %1485 = vmatprep.subr.bf16.mxu0 %v1484_v21 }
 0x372   :  { %1447 = vmatpush1.bf16.msra.mxu1 %v1446_v27  ;;  %v1488_v27 = vpack.c.bf16 %v986_v25, %v984_v24  ;;  %1487 = vmatpush1.bf16.msra.mxu0 %v1486_v26 }
 0x373   :  { %1449 = vmatprep.subr.bf16.mxu1 %v1448_v28  ;;  %v983_v28 = vld [vmem:[#allocation14 + $0x80] sm:$0xff] }
 0x374   :  { %v1490_v32 = vpack.c.bf16 %v985_v29, %v983_v28  ;;  %1489 = vmatprep.subr.bf16.mxu0 %v1488_v27  ;;  %v1016_v29 = vld [vmem:[#allocation14 + $0x188] sm:$0xff] }
 0x376   :  { %1451 = vmatpush1.bf16.msra.mxu1 %v1450_v33  ;;  %v1492_v33 = vpack.c.bf16 %v990_v31, %v988_v30  ;;  %1491 = vmatpush1.bf16.msra.mxu0 %v1490_v32  ;;  %v1018_v30 = vld [vmem:[#allocation14 + $0x198] sm:$0xff]  ;;  %v1015_v32 = vld [vmem:[#allocation14 + $0x180] sm:$0xff] }
 0x377   :  { %1453 = vmatprep.subr.bf16.mxu1 %v1452_v34  ;;  %v987_v34 = vld [vmem:[#allocation14 + $0xa0] sm:$0xff]  ;;  %v1520_v31 = vpack.c.bf16 %v1018_v30, %v1016_v29 }
 0x378   :  { %v1494_v38 = vpack.c.bf16 %v989_v35, %v987_v34  ;;  %1493 = vmatprep.subr.bf16.mxu0 %v1492_v33  ;;  %v1017_v33 = vld [vmem:[#allocation14 + $0x190] sm:$0xff]  ;;  %v1020_v35 = vld [vmem:[#allocation14 + $0x1a8] sm:$0xff] }
 0x379   :  { %v1522_v34 = vpack.c.bf16 %v1017_v33, %v1015_v32 }
 0x37a   :  { %1455 = vmatpush1.bf16.msra.mxu1 %v1454_v37  ;;  %v994_v37 = vld [vmem:[#allocation14 + $0xd8] sm:$0xff]  ;;  %1495 = vmatpush1.bf16.msra.mxu0 %v1494_v38  ;;  %v1019_v38 = vld [vmem:[#allocation14 + $0x1a0] sm:$0xff] }
 0x37b   :  { %1457 = vmatprep.subr.bf16.mxu1 %v1456_v40  ;;  %v1496_v39 = vpack.c.bf16 %v994_v37, %v992_v36  ;;  %v991_v40 = vld [vmem:[#allocation14 + $0xc0] sm:$0xff]  ;;  %v1022_v36 = vld [vmem:[#allocation14 + $0x1b8] sm:$0xff] }
 0x37c   :  { %v1498_v44 = vpack.c.bf16 %v993_v41, %v991_v40  ;;  %v1524_v37 = vpack.c.bf16 %v1022_v36, %v1020_v35  ;;  %v1024_v41 = vld [vmem:[#allocation14 + $0x1c8] sm:$0xff] }
 0x37d   :  { %1497 = vmatprep.subr.bf16.mxu0 %v1496_v39  ;;  %v1021_v39 = vld [vmem:[#allocation14 + $0x1b0] sm:$0xff] }
 0x37e   :  { %1459 = vmatpush1.bf16.msra.mxu1 %v1458_v43  ;;  %v998_v43 = vld [vmem:[#allocation14 + $0xf8] sm:$0xff]  ;;  %1499 = vmatpush1.bf16.msra.mxu0 %v1498_v44  ;;  %v1526_v40 = vpack.c.bf16 %v1021_v39, %v1019_v38  ;;  %v1023_v44 = vld [vmem:[#allocation14 + $0x1c0] sm:$0xff] }
 0x37f   :  { %1461 = vmatprep.subr.bf16.mxu1 %v1460_v46  ;;  %v1500_v45 = vpack.c.bf16 %v998_v43, %v996_v42  ;;  %v995_v46 = vld [vmem:[#allocation14 + $0xe0] sm:$0xff]  ;;  %v1026_v42 = vld [vmem:[#allocation14 + $0x1d8] sm:$0xff] }
 0x380   :  { %v1502_v50 = vpack.c.bf16 %v997_v47, %v995_v46  ;;  %v1528_v43 = vpack.c.bf16 %v1026_v42, %v1024_v41  ;;  %v1028_v47 = vld [vmem:[#allocation14 + $0x1e8] sm:$0xff] }
 0x381   :  { %1501 = vmatprep.subr.bf16.mxu0 %v1500_v45  ;;  %v1025_v45 = vld [vmem:[#allocation14 + $0x1d0] sm:$0xff] }
 0x382   :  { %1463 = vmatpush1.bf16.msra.mxu1 %v1462_v49  ;;  %v1002_v49 = vld [vmem:[#allocation14 + $0x118] sm:$0xff]  ;;  %1503 = vmatpush1.bf16.msra.mxu0 %v1502_v50  ;;  %v1530_v46 = vpack.c.bf16 %v1025_v45, %v1023_v44 }
 0x383   :  { %1465 = vmatprep.subr.bf16.mxu1 %v1464_v51  ;;  %v1504_v0 = vpack.c.bf16 %v1002_v49, %v1000_v48  ;;  %v999_v51 = vld [vmem:[#allocation14 + $0x100] sm:$0xff]  ;;  %v1030_v48 = vld [vmem:[#allocation14 + $0x1f8] sm:$0xff] }
 0x384   :  { %v1506_v55 = vpack.c.bf16 %v1001_v52, %v999_v51  ;;  %v1027_v49 = vld [vmem:[#allocation14 + $0x1e0] sm:$0xff]  ;;  %v1532_v50 = vpack.c.bf16 %v1030_v48, %v1028_v47 }
 0x385   :  { %1505 = vmatprep.subr.bf16.mxu0 %v1504_v0  ;;  %v1029_v0 = vld [vmem:[#allocation14 + $0x1f0] sm:$0xff]  ;;  %v874_v52 = vld [vmem:[%s2089_s11] sm:$0x3] }
 0x386   :  { %1467 = vmatpush1.bf16.msra.mxu1 %v1466_v54  ;;  %v1006_v54 = vld [vmem:[#allocation14 + $0x138] sm:$0xff]  ;;  %1507 = vmatpush1.bf16.msra.mxu0 %v1506_v55  ;;  %v1534_v51 = vpack.c.bf16 %v1029_v0, %v1027_v49 }
 0x387   :  { %1469 = vmatprep.subr.bf16.mxu1 %v1468_v60  ;;  %v1508_v56 = vpack.c.bf16 %v1006_v54, %v1004_v53  ;;  %v1005_v60 = vld [vmem:[#allocation14 + $0x130] sm:$0xff]  ;;  %v879_v53 = vrot.slane %v874_v52, %v2017_v59  ;;  %v883_v54 = vrot.slane %v874_v52, %v2023_v61 }
 0x388   :  { %v1510_v1 = vpack.c.bf16 %v1005_v60, %v1003_v57 }
 0x389   :  { %1509 = vmatprep.subr.bf16.mxu0 %v1508_v56 }
 0x38a   :  { %1471 = vmatpush1.bf16.msra.mxu1 %v1470_v63  ;;  %v1010_v63 = vld [vmem:[#allocation14 + $0x158] sm:$0xff]  ;;  %1511 = vmatpush1.bf16.msra.mxu0 %v1510_v1 }
 0x38b   :  { %v1512_v2 = vpack.c.bf16 %v1010_v63, %v1008_v62 }
 0x38d   :  { %1513 = vmatprep.subr.bf16.mxu0 %v1512_v2 }
 0x38e   :  { %1515 = vmatpush1.bf16.msra.mxu0 %v1514_v7  ;;  %v649_v7 = vsub.s32 2, %v2014_v58 }
 0x38f   :  { %1517 = vmatprep.subr.bf16.mxu0 %v1516_v8  ;;  %v1031_v8 = vld [vmem:[%s2091_s13] sm:$0x3]  ;;  %s1766_s13 = scalar_lea.vmem %s1138_s21, 1280 }
 0x390   :  { %v650_v9 = vrot.slane %v2042_v12, %v649_v7  ;;  %v1036_v10 = vrot.slane %v1031_v8, %v2017_v59  ;;  %p1767_p8 = scmp.ne.s32.totalorder %s1138_s21, %s1766_s13  ;;  %p1772_p10 = scmp.lt.s32.totalorder %s1766_s13, %s1766_s13 }
 0x392   :  { %1519 = vmatpush1.bf16.msra.mxu0 %v1518_v11  ;;  %v1040_v11 = vrot.slane %v1031_v8, %v2023_v61  ;;  %p1773_p11 = por %p1772_p10, %p1771_p9 }
 0x393   :  { %1521 = vmatprep.subr.bf16.mxu0 %v1520_v31 }
 0x394   :  { %p1774_p12 = pnand %p1773_p11, %p1767_p8 }
 0x396   :  { %1523 = vmatpush1.bf16.msra.mxu0 %v1522_v34 }
 0x397   :  { %1525 = vmatprep.subr.bf16.mxu0 %v1524_v37 }
 0x39a   :  { %1527 = vmatpush1.bf16.msra.mxu0 %v1526_v40 }
 0x39b   :  { %1529 = vmatprep.subr.bf16.mxu0 %v1528_v43 }
 0x39e   :  { %1531 = vmatpush1.bf16.msra.mxu0 %v1530_v46 }
 0x39f   :  { %1533 = vmatprep.subr.bf16.mxu0 %v1532_v50 }
 0x3a2   :  { %1535 = vmatpush1.bf16.msra.mxu0 %v1534_v51 }
 0x420   :  { %v720_v15 = vpop.f32.mrb[4].mxu1 }
 0x421   :  { %v721_v16 = vadd.f32 %v720_v15, %v642_v13  ;;  %v722_v17 = vpop.f32.mrb[5].mxu1 }
 0x422   :  { %v723_v18 = vadd.f32 %v722_v17, %v646_v14 }
 0x424   :  { %1574 = vtanh.f32 %v723_v18  ;;  %v726_v19 = vpop.f32.mrb[6].mxu1  ;;  %v2048_v20 = vpop.f32.mrb[8].mxu0 }
 0x425   :  { %1576 = vtanh.f32 %v721_v16  ;;  %v727_v21 = vadd.f32 %v726_v19, %v642_v13  ;;  %v728_v22 = vpop.f32.mrb[7].mxu1  ;;  %v2050_v23 = vpop.f32.mrb[9].mxu0  ;;  %v803_v19 = vadd.f32 %v2048_v20, %v650_v9 }
 0x426   :  { %v729_v24 = vadd.f32 %v728_v22, %v646_v14  ;;  %v798_v14 = vadd.f32 %v2050_v23, %v650_v9 }
 0x428   :  { %1578 = vtanh.f32 %v729_v24 }
 0x429   :  { %1580 = vtanh.f32 %v727_v21 }
 0x42e   :  { %v1575_v25 = vpop.eup %1574 }
 0x42f   :  { %v1577_v26 = vpop.eup %1576  ;;  %950 = vmatprep.mubr.f32.mxu1 %v1575_v25 }
 0x430   :  { %951 = vmatmul.mubr.f32.vlgmr.msra.gmra.mrb[8].mxu1 %v1577_v26 }
 0x432   :  { %v1579_v27 = vpop.eup %1578 }
 0x433   :  { %v1581_v28 = vpop.eup %1580  ;;  %956 = vmatprep.mubr.f32.mxu1 %v1579_v27 }
 0x434   :  { %957 = vmatmul.mubr.f32.gmra.mrb[10].mxu1 %v1581_v28 }
 0x503   :  { %v952_v55 = vpop.f32.mrb[8].mxu1 }
 0x504   :  { %v953_v56 = vadd.f32 %v952_v55, %v879_v53  ;;  %v954_v57 = vpop.f32.mrb[9].mxu1 }
 0x505   :  { %v955_v60 = vadd.f32 %v954_v57, %v883_v54 }
 0x507   :  { %1582 = vtanh.f32 %v955_v60  ;;  %v958_v62 = vpop.f32.mrb[10].mxu1 }
 0x508   :  { %1584 = vtanh.f32 %v953_v56  ;;  %v959_v63 = vadd.f32 %v958_v62, %v879_v53  ;;  %v960_v1 = vpop.f32.mrb[11].mxu1 }
 0x509   :  { %v961_v2 = vadd.f32 %v960_v1, %v883_v54 }
 0x50b   :  { %1586 = vtanh.f32 %v961_v2 }
 0x50c   :  { %1588 = vtanh.f32 %v959_v63 }
 0x511   :  { %v1583_v3 = vpop.eup %1582 }
 0x512   :  { %v1585_v4 = vpop.eup %1584  ;;  %1107 = vmatprep.mubr.f32.mxu0 %v1583_v3 }
 0x513   :  { %1108 = vmatmul.mubr.f32.vlgmr.msra.gmra.mrb[10].mxu0 %v1585_v4 }
 0x515   :  { %v1587_v5 = vpop.eup %1586 }
 0x516   :  { %v1589_v6 = vpop.eup %1588  ;;  %1113 = vmatprep.mubr.f32.mxu0 %v1587_v5 }
 0x517   :  { %1114 = vmatmul.mubr.f32.gmra.mrb[12].mxu0 %v1589_v6 }
 0x5e6   :  { %v1109_v13 = vpop.f32.mrb[10].mxu0 }
 0x5e7   :  { %v1110_v15 = vadd.f32 %v1109_v13, %v1036_v10  ;;  %v1111_v16 = vpop.f32.mrb[11].mxu0 }
 0x5e8   :  { %v1112_v17 = vadd.f32 %v1111_v16, %v1040_v11 }
 0x5e9   :  { %v1120_v18 = vadd.f32 %v1110_v15, %v798_v14 }
 0x5ea   :  { %1123 = vst [vmem:[#allocation16 + $0x8] sm:$0xff] %v1112_v17  ;;  %v1115_v58 = vpop.f32.mrb[12].mxu0 }
 0x5eb   :  { %1122 = vst [vmem:[#allocation16] sm:$0xff] %v1120_v18  ;;  %v1116_v21 = vadd.f32 %v1115_v58, %v1036_v10  ;;  %v1117_v12 = vpop.f32.mrb[13].mxu0 }
 0x5ec   :  { %v1118_v22 = vadd.f32 %v1117_v12, %v1040_v11 }
 0x5ed   :  { %v1121_v59 = vadd.f32 %v1116_v21, %v803_v19 }
 0x5ee   :  { %1128 = vst [vmem:[#allocation16 + $0x30] sm:$0xff] %v1118_v22 }
 0x5ef   :  { %1127 = vst [vmem:[#allocation16 + $0x28] sm:$0xff] %v1121_v59 }
 0x5f0   :  { %1777 = shalt.err (!%p1774_p12)
}
 0x5f1   :  { %s1778_s20 = scalar_lea.hbm %s2092_s14, 1280 }
 0x5f2   :  { %p1779_p13 = scmp.ne.s32.totalorder %s2092_s14, %s1778_s20  ;;  %p1782_p0 = scmp.lt.u32.totalorder %s1778_s20, %s2092_s14 }
 0x5f4   :  { %p1784_p1 = pnand %p1782_p0, %p1779_p13 }
 0x5f6   :  { %1787 = shalt.err (!%p1784_p1)
}
 0x5f7   :  { %s1816_s25 = smov 640   ;;  %s1817_s1 = smov 40  }
 0x5f8   :  { %1143 = dma.vmem_to_hbm [thread:$0]  %s1138_s21, 1280, %s2092_s14, [#allocation4], %s1816_s25, %s1816_s25, %s1817_s1  }
 0x5f9   :  { %1798 = dma.done.wait [#allocation4], 1280  }
 0x5fa   :  { %1799 = vsyncadd [#allocation4], 4294966016 }
 0x5fb   :  { %1147 = vsyncpa [#allocation3], 1 }
 0x5fc   :  { %1148 = vsyncpa [#allocation6], 1 }
 0x5fd   :  { %1149 = vsyncpa [#allocation9], 1 }
 0x5fe   :  { %1150 = vsyncpa [#allocation12], 1 }
 0x5ff   :  { %1151 = vsyncpa [#allocation15], 1 }
 0x600   :  { %1152 = vsyncpa [#allocation4], 1 }

</bundles_post_ra>
